<compile_context>
chip_gen: v6e
topology: v6e:2x2x1
jax: 0.10.0
libtpu: 0.0.40
codegen_flags: <defaults>
</compile_context>

<pallas_src>
import functools

import jax
import jax.numpy as jnp
from jax import lax
from jax.experimental import pallas as pl
from jax.experimental.pallas import tpu as pltpu


def _disblock_kernel(*refs, W, downsample, learnable_sc):
    if downsample:
        (x_ref, mask_ref, w1_ref, b1_ref, w2_ref, b2_ref, wsc_ref, bsc_ref,
         p_ref, o_ref, a1_ref, a2_ref) = refs
    else:
        (x_ref, mask_ref, w1_ref, b1_ref, w2_ref, b2_ref, wsc_ref, bsc_ref,
         o_ref, a1_ref, a2_ref) = refs
        p_ref = None

    NS = x_ref.shape[1]                      # N * H * W (lane dimension)

    x = x_ref[...]                           # (Cin, NS) channels-first, lane-dense
    h = jnp.maximum(x, 0.0)                  # activation before c1

    def build_im2col(src, a_ref):
        """Stack the 9 shifted/masked taps of `src` along the contraction axis."""
        c = src.shape[0]
        for kh in range(3):
            for kw in range(3):
                t = kh * 3 + kw
                d = (kh - 1) * W + (kw - 1)              # flattened spatial shift
                if d == 0:
                    tap = src                             # center tap, mask == 1
                else:
                    tap = pltpu.roll(src, (-d) % NS, axis=1)     # XLU lane rotate
                    tap = tap * mask_ref[t:t + 1, :]             # zero-pad boundaries
                a_ref[t * c:(t + 1) * c, :] = tap
        return a_ref[...]                                 # (9*c, NS)

    # ---- c1: 3x3 conv, pad=1, as ONE K = 9*Cin matmul ----
    a1 = build_im2col(h, a1_ref)
    y1 = jnp.dot(w1_ref[...], a1, preferred_element_type=jnp.float32) + b1_ref[...]
    y1 = jnp.maximum(y1, 0.0)                             # activation before c2

    # ---- c2: 3x3 conv, pad=1, as ONE K = 9*Chid matmul ----
    a2 = build_im2col(y1, a2_ref)
    y2 = jnp.dot(w2_ref[...], a2, preferred_element_type=jnp.float32) + b2_ref[...]

    # ---- shortcut: 1x1 conv on the pre-activation input ----
    if learnable_sc:
        sc = jnp.dot(wsc_ref[...], x, preferred_element_type=jnp.float32) + bsc_ref[...]
    else:
        sc = x                                            # Cin == Cout in this branch

    total = y2 + sc                                       # pool once (pooling is linear)

    if downsample:
        # 2x2 average pool as a single matmul with the precomputed pooling matrix.
        total = jnp.dot(total, p_ref[...], preferred_element_type=jnp.float32)

    o_ref[...] = total.astype(o_ref.dtype)                # (Cout, N*Ho*Wo) lane-dense


def disblock_forward(x_nchw, w1, b1, w2, b2, wsc, bsc, *, downsample=True):
    """x_nchw: (N, Cin, H, W) float32; conv weights are HWIO; biases are (1, C)."""
    x_nchw = x_nchw.astype(jnp.float32)
    N, Cin, H, W = x_nchw.shape
    Chid = w1.shape[3]
    Cout = w2.shape[3]
    learnable_sc = (Cin != Cout) or downsample
    if downsample:
        assert H % 2 == 0 and W % 2 == 0, "2x2 avg-pool assumes even spatial dims"
    Ho, Wo = (H // 2, W // 2) if downsample else (H, W)
    S, So = H * W, Ho * Wo
    NS, NSo = N * S, N * So

    # Channels-first, lane-dense input slab: (Cin, N*H*W).
    x_cf = jnp.transpose(x_nchw, (1, 0, 2, 3)).reshape(Cin, NS)

    # Conv weights folded onto a single contraction axis (tap-major, channel-minor).
    w1t = jnp.asarray(w1, jnp.float32).reshape(9 * Cin, Chid).T      # (Chid, 9*Cin)
    w2t = jnp.asarray(w2, jnp.float32).reshape(9 * Chid, Cout).T     # (Cout, 9*Chid)
    wsct = jnp.asarray(wsc, jnp.float32).T                           # (Cout, Cin)
    b1c = jnp.asarray(b1, jnp.float32).reshape(Chid, 1)
    b2c = jnp.asarray(b2, jnp.float32).reshape(Cout, 1)
    bscc = jnp.asarray(bsc, jnp.float32).reshape(Cout, 1)

    # Zero-padding boundary masks for the 9 taps, tiled over the batch: (9, N*H*W).
    yy = jnp.arange(S, dtype=jnp.int32) // W
    xx = jnp.arange(S, dtype=jnp.int32) % W
    mrows = []
    for kh in range(3):
        for kw in range(3):
            dy, dx = kh - 1, kw - 1
            ok = ((yy + dy >= 0) & (yy + dy < H) &
                  (xx + dx >= 0) & (xx + dx < W)).astype(jnp.float32)
            mrows.append(jnp.tile(ok, N))
    mask = jnp.stack(mrows, axis=0)                                  # (9, NS)

    inputs = [x_cf, mask, w1t, b1c, w2t, b2c, wsct, bscc]
    in_specs = [
        pl.BlockSpec((Cin, NS), lambda i: (0, 0)),
        pl.BlockSpec((9, NS), lambda i: (0, 0)),
        pl.BlockSpec((Chid, 9 * Cin), lambda i: (0, 0)),
        pl.BlockSpec((Chid, 1), lambda i: (0, 0)),
        pl.BlockSpec((Cout, 9 * Chid), lambda i: (0, 0)),
        pl.BlockSpec((Cout, 1), lambda i: (0, 0)),
        pl.BlockSpec((Cout, Cin), lambda i: (0, 0)),
        pl.BlockSpec((Cout, 1), lambda i: (0, 0)),
    ]

    if downsample:
        # Precomputed 2x2 average-pool matrix: (N*H*W, N*Ho*Wo), entries 0.25.
        flat = jnp.arange(NS, dtype=jnp.int32)
        n_i, pos = flat // S, flat % S
        py, px = pos // W, pos % W
        col = n_i * So + (py // 2) * Wo + (px // 2)
        pool_mat = jax.nn.one_hot(col, NSo, dtype=jnp.float32) * 0.25
        inputs.append(pool_mat)
        in_specs.append(pl.BlockSpec((NS, NSo), lambda i: (0, 0)))

    kernel = functools.partial(_disblock_kernel, W=W,
                               downsample=downsample, learnable_sc=learnable_sc)

    out_cf = pl.pallas_call(
        kernel,
        out_shape=jax.ShapeDtypeStruct((Cout, NSo), jnp.float32),
        grid_spec=pltpu.PrefetchScalarGridSpec(
            num_scalar_prefetch=0,
            grid=(1,),                                    # whole batch in one step
            in_specs=in_specs,
            out_specs=pl.BlockSpec((Cout, NSo), lambda i: (0, 0)),
            scratch_shapes=[
                pltpu.VMEM((9 * Cin, NS), jnp.float32),   # im2col operand for c1
                pltpu.VMEM((9 * Chid, NS), jnp.float32),  # im2col operand for c2
            ]),
        compiler_params=pltpu.CompilerParams(dimension_semantics=("arbitrary",)),
    )(*inputs)

    # (Cout, N*Ho*Wo) -> (N, Cout, Ho, Wo)
    return out_cf.reshape(Cout, N, Ho, Wo).transpose(1, 0, 2, 3)


def _ref_disblock(x_nchw, w1, b1, w2, b2, wsc, bsc, *, downsample=True):
    """Pure-JAX reference (matches the PyTorch forward)."""
    x = jnp.transpose(x_nchw, (0, 2, 3, 1)).astype(jnp.float32)

    def conv(h, w, b, pad):
        y = lax.conv_general_dilated(h, w, (1, 1), [(pad, pad), (pad, pad)],
                                     dimension_numbers=('NHWC', 'HWIO', 'NHWC'))
        return y + b.reshape(1, 1, 1, -1)

    def pool(h):
        n, hh, ww, c = h.shape
        return h.reshape(n, hh // 2, 2, ww // 2, 2, c).mean(axis=(2, 4))

    Cin, Cout = x.shape[3], w2.shape[3]
    learnable_sc = (Cin != Cout) or downsample

    h = jax.nn.relu(x)
    h = conv(h, w1, b1, 1)
    h = jax.nn.relu(h)
    h = conv(h, w2, b2, 1)
    if downsample:
        h = pool(h)
    if learnable_sc:
        sc = conv(x, wsc.reshape(1, 1, Cin, Cout), bsc, 0)
        if downsample:
            sc = pool(sc)
    else:
        sc = x
    return jnp.transpose(h + sc, (0, 3, 1, 2))


if __name__ == "__main__":
    # NOTE: args.d_spectral_norm = False for this synthetic instantiation.
    N, Cin, H, W = 2, 4, 16, 16
    Chid, Cout = Cin, 8               # hidden_channels defaults to in_channels
    downsample = True

    key = jax.random.PRNGKey(0)
    kx, k1, k2, k3, k4, k5, k6 = jax.random.split(key, 7)

    x = jax.random.normal(kx, (N, Cin, H, W), jnp.float32)            # NCHW input
    w1 = jax.random.normal(k1, (3, 3, Cin, Chid), jnp.float32) * 0.1  # HWIO
    b1 = jax.random.normal(k2, (1, Chid), jnp.float32) * 0.01
    w2 = jax.random.normal(k3, (3, 3, Chid, Cout), jnp.float32) * 0.1
    b2 = jax.random.normal(k4, (1, Cout), jnp.float32) * 0.01
    wsc = jax.random.normal(k5, (Cin, Cout), jnp.float32) * 0.1       # 1x1 conv
    bsc = jax.random.normal(k6, (1, Cout), jnp.float32) * 0.01

    out = disblock_forward(x, w1, b1, w2, b2, wsc, bsc, downsample=downsample)
    out = jax.block_until_ready(out)

    ref = _ref_disblock(x, w1, b1, w2, b2, wsc, bsc, downsample=downsample)
    ref = jax.block_until_ready(ref)

    assert out.shape == (N, Cout, H // 2, W // 2), out.shape
    assert jnp.allclose(out, ref, atol=1e-4, rtol=1e-4), \
        float(jnp.max(jnp.abs(out - ref)))

    print("KERNEL_OK")
</pallas_src>

<mosaic_0001>
module attributes {stable_mosaic.version = 11 : i64} {
  func.func @_disblock_kernel(%arg0: i32, %arg1: memref<4x512xf32, #tpu.memory_space<vmem>>, %arg2: memref<9x512xf32, #tpu.memory_space<vmem>>, %arg3: memref<4x36xf32, #tpu.memory_space<vmem>>, %arg4: memref<4x1xf32, #tpu.memory_space<vmem>>, %arg5: memref<8x36xf32, #tpu.memory_space<vmem>>, %arg6: memref<8x1xf32, #tpu.memory_space<vmem>>, %arg7: memref<8x4xf32, #tpu.memory_space<vmem>>, %arg8: memref<8x1xf32, #tpu.memory_space<vmem>>, %arg9: memref<512x128xf32, #tpu.memory_space<vmem>>, %arg10: memref<8x128xf32, #tpu.memory_space<vmem>>, %arg11: memref<36x512xf32, #tpu.memory_space<vmem>>, %arg12: memref<36x512xf32, #tpu.memory_space<vmem>>) attributes {dimension_semantics = [#tpu.dimension_semantics<arbitrary>], iteration_bounds = array<i64: 1>, scalar_prefetch = 0 : i64, scratch_operands = 2 : i64, tpu.core_type = #tpu.core_type<tc>, window_params = [{pipeline_mode = #tpu.pipeline_mode<synchronous>, transform_indices = @transform_0, window_bounds = array<i64: 4, 512>}, {pipeline_mode = #tpu.pipeline_mode<synchronous>, transform_indices = @transform_1, window_bounds = array<i64: 9, 512>}, {pipeline_mode = #tpu.pipeline_mode<synchronous>, transform_indices = @transform_2, window_bounds = array<i64: 4, 36>}, {pipeline_mode = #tpu.pipeline_mode<synchronous>, transform_indices = @transform_3, window_bounds = array<i64: 4, 1>}, {pipeline_mode = #tpu.pipeline_mode<synchronous>, transform_indices = @transform_4, window_bounds = array<i64: 8, 36>}, {pipeline_mode = #tpu.pipeline_mode<synchronous>, transform_indices = @transform_5, window_bounds = array<i64: 8, 1>}, {pipeline_mode = #tpu.pipeline_mode<synchronous>, transform_indices = @transform_6, window_bounds = array<i64: 8, 4>}, {pipeline_mode = #tpu.pipeline_mode<synchronous>, transform_indices = @transform_7, window_bounds = array<i64: 8, 1>}, {pipeline_mode = #tpu.pipeline_mode<synchronous>, transform_indices = @transform_8, window_bounds = array<i64: 512, 128>}, {pipeline_mode = #tpu.pipeline_mode<synchronous>, transform_indices = @transform_9, window_bounds = array<i64: 8, 128>}]} {
    %c0 = arith.constant 0 : index
    %c0_0 = arith.constant 0 : index
    %0 = vector.load %arg1[%c0, %c0_0] : memref<4x512xf32, #tpu.memory_space<vmem>>, vector<4x512xf32>
    %cst = arith.constant 0.000000e+00 : f32
    %1 = vector.broadcast %cst : f32 to vector<4x512xf32>
    %2 = arith.maximumf %0, %1 : vector<4x512xf32>
    %c17_i32 = arith.constant 17 : i32
    %3 = tpu.dynamic_rotate %2 by %c17_i32 dim 1 : vector<4x512xf32>, i32 -> vector<4x512xf32>
    %c0_1 = arith.constant 0 : index
    %c0_2 = arith.constant 0 : index
    %4 = vector.load %arg2[%c0_1, %c0_2] : memref<9x512xf32, #tpu.memory_space<vmem>>, vector<1x512xf32>
    %5 = vector.broadcast %4 : vector<1x512xf32> to vector<4x512xf32>
    %6 = arith.mulf %3, %5 : vector<4x512xf32>
    %c0_3 = arith.constant 0 : index
    %c0_4 = arith.constant 0 : index
    %7 = vector.load %arg11[%c0_3, %c0_4] : memref<36x512xf32, #tpu.memory_space<vmem>>, vector<4x512xf32>
    tpu.vector_store %arg11[%c0_3, %c0_4], %6 {strides = array<i32>} : memref<36x512xf32, #tpu.memory_space<vmem>>, vector<4x512xf32>,
    %c16_i32 = arith.constant 16 : i32
    %8 = tpu.dynamic_rotate %2 by %c16_i32 dim 1 : vector<4x512xf32>, i32 -> vector<4x512xf32>
    %c1 = arith.constant 1 : index
    %c0_5 = arith.constant 0 : index
    %9 = vector.load %arg2[%c1, %c0_5] : memref<9x512xf32, #tpu.memory_space<vmem>>, vector<1x512xf32>
    %10 = vector.broadcast %9 : vector<1x512xf32> to vector<4x512xf32>
    %11 = arith.mulf %8, %10 : vector<4x512xf32>
    %c4 = arith.constant 4 : index
    %c0_6 = arith.constant 0 : index
    %12 = vector.load %arg11[%c4, %c0_6] : memref<36x512xf32, #tpu.memory_space<vmem>>, vector<4x512xf32>
    tpu.vector_store %arg11[%c4, %c0_6], %11 {strides = array<i32>} : memref<36x512xf32, #tpu.memory_space<vmem>>, vector<4x512xf32>,
    %c15_i32 = arith.constant 15 : i32
    %13 = tpu.dynamic_rotate %2 by %c15_i32 dim 1 : vector<4x512xf32>, i32 -> vector<4x512xf32>
    %c2 = arith.constant 2 : index
    %c0_7 = arith.constant 0 : index
    %14 = vector.load %arg2[%c2, %c0_7] : memref<9x512xf32, #tpu.memory_space<vmem>>, vector<1x512xf32>
    %15 = vector.broadcast %14 : vector<1x512xf32> to vector<4x512xf32>
    %16 = arith.mulf %13, %15 : vector<4x512xf32>
    %c8 = arith.constant 8 : index
    %c0_8 = arith.constant 0 : index
    %17 = vector.load %arg11[%c8, %c0_8] : memref<36x512xf32, #tpu.memory_space<vmem>>, vector<4x512xf32>
    tpu.vector_store %arg11[%c8, %c0_8], %16 {strides = array<i32>} : memref<36x512xf32, #tpu.memory_space<vmem>>, vector<4x512xf32>,
    %c1_i32 = arith.constant 1 : i32
    %18 = tpu.dynamic_rotate %2 by %c1_i32 dim 1 : vector<4x512xf32>, i32 -> vector<4x512xf32>
    %c3 = arith.constant 3 : index
    %c0_9 = arith.constant 0 : index
    %19 = vector.load %arg2[%c3, %c0_9] : memref<9x512xf32, #tpu.memory_space<vmem>>, vector<1x512xf32>
    %20 = vector.broadcast %19 : vector<1x512xf32> to vector<4x512xf32>
    %21 = arith.mulf %18, %20 : vector<4x512xf32>
    %c12 = arith.constant 12 : index
    %c0_10 = arith.constant 0 : index
    %22 = vector.load %arg11[%c12, %c0_10] : memref<36x512xf32, #tpu.memory_space<vmem>>, vector<4x512xf32>
    tpu.vector_store %arg11[%c12, %c0_10], %21 {strides = array<i32>} : memref<36x512xf32, #tpu.memory_space<vmem>>, vector<4x512xf32>,
    %c16 = arith.constant 16 : index
    %c0_11 = arith.constant 0 : index
    %23 = vector.load %arg11[%c16, %c0_11] : memref<36x512xf32, #tpu.memory_space<vmem>>, vector<4x512xf32>
    tpu.vector_store %arg11[%c16, %c0_11], %2 {strides = array<i32>} : memref<36x512xf32, #tpu.memory_space<vmem>>, vector<4x512xf32>,
    %c511_i32 = arith.constant 511 : i32
    %24 = tpu.dynamic_rotate %2 by %c511_i32 dim 1 : vector<4x512xf32>, i32 -> vector<4x512xf32>
    %c5 = arith.constant 5 : index
    %c0_12 = arith.constant 0 : index
    %25 = vector.load %arg2[%c5, %c0_12] : memref<9x512xf32, #tpu.memory_space<vmem>>, vector<1x512xf32>
    %26 = vector.broadcast %25 : vector<1x512xf32> to vector<4x512xf32>
    %27 = arith.mulf %24, %26 : vector<4x512xf32>
    %c20 = arith.constant 20 : index
    %c0_13 = arith.constant 0 : index
    %28 = vector.load %arg11[%c20, %c0_13] : memref<36x512xf32, #tpu.memory_space<vmem>>, vector<4x512xf32>
    tpu.vector_store %arg11[%c20, %c0_13], %27 {strides = array<i32>} : memref<36x512xf32, #tpu.memory_space<vmem>>, vector<4x512xf32>,
    %c497_i32 = arith.constant 497 : i32
    %29 = tpu.dynamic_rotate %2 by %c497_i32 dim 1 : vector<4x512xf32>, i32 -> vector<4x512xf32>
    %c6 = arith.constant 6 : index
    %c0_14 = arith.constant 0 : index
    %30 = vector.load %arg2[%c6, %c0_14] : memref<9x512xf32, #tpu.memory_space<vmem>>, vector<1x512xf32>
    %31 = vector.broadcast %30 : vector<1x512xf32> to vector<4x512xf32>
    %32 = arith.mulf %29, %31 : vector<4x512xf32>
    %c24 = arith.constant 24 : index
    %c0_15 = arith.constant 0 : index
    %33 = vector.load %arg11[%c24, %c0_15] : memref<36x512xf32, #tpu.memory_space<vmem>>, vector<4x512xf32>
    tpu.vector_store %arg11[%c24, %c0_15], %32 {strides = array<i32>} : memref<36x512xf32, #tpu.memory_space<vmem>>, vector<4x512xf32>,
    %c496_i32 = arith.constant 496 : i32
    %34 = tpu.dynamic_rotate %2 by %c496_i32 dim 1 : vector<4x512xf32>, i32 -> vector<4x512xf32>
    %c7 = arith.constant 7 : index
    %c0_16 = arith.constant 0 : index
    %35 = vector.load %arg2[%c7, %c0_16] : memref<9x512xf32, #tpu.memory_space<vmem>>, vector<1x512xf32>
    %36 = vector.broadcast %35 : vector<1x512xf32> to vector<4x512xf32>
    %37 = arith.mulf %34, %36 : vector<4x512xf32>
    %c28 = arith.constant 28 : index
    %c0_17 = arith.constant 0 : index
    %38 = vector.load %arg11[%c28, %c0_17] : memref<36x512xf32, #tpu.memory_space<vmem>>, vector<4x512xf32>
    tpu.vector_store %arg11[%c28, %c0_17], %37 {strides = array<i32>} : memref<36x512xf32, #tpu.memory_space<vmem>>, vector<4x512xf32>,
    %c495_i32 = arith.constant 495 : i32
    %39 = tpu.dynamic_rotate %2 by %c495_i32 dim 1 : vector<4x512xf32>, i32 -> vector<4x512xf32>
    %c8_18 = arith.constant 8 : index
    %c0_19 = arith.constant 0 : index
    %40 = vector.load %arg2[%c8_18, %c0_19] : memref<9x512xf32, #tpu.memory_space<vmem>>, vector<1x512xf32>
    %41 = vector.broadcast %40 : vector<1x512xf32> to vector<4x512xf32>
    %42 = arith.mulf %39, %41 : vector<4x512xf32>
    %c32 = arith.constant 32 : index
    %c0_20 = arith.constant 0 : index
    %43 = vector.load %arg11[%c32, %c0_20] : memref<36x512xf32, #tpu.memory_space<vmem>>, vector<4x512xf32>
    tpu.vector_store %arg11[%c32, %c0_20], %42 {strides = array<i32>} : memref<36x512xf32, #tpu.memory_space<vmem>>, vector<4x512xf32>,
    %c0_21 = arith.constant 0 : index
    %c0_22 = arith.constant 0 : index
    %44 = vector.load %arg11[%c0_21, %c0_22] : memref<36x512xf32, #tpu.memory_space<vmem>>, vector<36x512xf32>
    %c0_23 = arith.constant 0 : index
    %c0_24 = arith.constant 0 : index
    %45 = vector.load %arg3[%c0_23, %c0_24] : memref<4x36xf32, #tpu.memory_space<vmem>>, vector<4x36xf32>
    %cst_25 = arith.constant dense<0.000000e+00> : vector<4x512xf32>
    %46 = tpu.matmul %45, %44, %cst_25 {dimension_numbers = #tpu.dot_dimension_numbers<[1], [0], [0], [1], [0, 0, 1, 1], [], []>} : vector<4x36xf32>, vector<36x512xf32>, vector<4x512xf32> -> vector<4x512xf32>
    %c0_26 = arith.constant 0 : index
    %c0_27 = arith.constant 0 : index
    %47 = vector.load %arg4[%c0_26, %c0_27] : memref<4x1xf32, #tpu.memory_space<vmem>>, vector<4x1xf32>
    %48 = vector.broadcast %47 : vector<4x1xf32> to vector<4x512xf32>
    %49 = arith.addf %46, %48 : vector<4x512xf32>
    %cst_28 = arith.constant 0.000000e+00 : f32
    %50 = vector.broadcast %cst_28 : f32 to vector<4x512xf32>
    %51 = arith.maximumf %49, %50 : vector<4x512xf32>
    %c17_i32_29 = arith.constant 17 : i32
    %52 = tpu.dynamic_rotate %51 by %c17_i32_29 dim 1 : vector<4x512xf32>, i32 -> vector<4x512xf32>
    %c0_30 = arith.constant 0 : index
    %c0_31 = arith.constant 0 : index
    %53 = vector.load %arg2[%c0_30, %c0_31] : memref<9x512xf32, #tpu.memory_space<vmem>>, vector<1x512xf32>
    %54 = vector.broadcast %53 : vector<1x512xf32> to vector<4x512xf32>
    %55 = arith.mulf %52, %54 : vector<4x512xf32>
    %c0_32 = arith.constant 0 : index
    %c0_33 = arith.constant 0 : index
    %56 = vector.load %arg12[%c0_32, %c0_33] : memref<36x512xf32, #tpu.memory_space<vmem>>, vector<4x512xf32>
    tpu.vector_store %arg12[%c0_32, %c0_33], %55 {strides = array<i32>} : memref<36x512xf32, #tpu.memory_space<vmem>>, vector<4x512xf32>,
    %c16_i32_34 = arith.constant 16 : i32
    %57 = tpu.dynamic_rotate %51 by %c16_i32_34 dim 1 : vector<4x512xf32>, i32 -> vector<4x512xf32>
    %c1_35 = arith.constant 1 : index
    %c0_36 = arith.constant 0 : index
    %58 = vector.load %arg2[%c1_35, %c0_36] : memref<9x512xf32, #tpu.memory_space<vmem>>, vector<1x512xf32>
    %59 = vector.broadcast %58 : vector<1x512xf32> to vector<4x512xf32>
    %60 = arith.mulf %57, %59 : vector<4x512xf32>
    %c4_37 = arith.constant 4 : index
    %c0_38 = arith.constant 0 : index
    %61 = vector.load %arg12[%c4_37, %c0_38] : memref<36x512xf32, #tpu.memory_space<vmem>>, vector<4x512xf32>
    tpu.vector_store %arg12[%c4_37, %c0_38], %60 {strides = array<i32>} : memref<36x512xf32, #tpu.memory_space<vmem>>, vector<4x512xf32>,
    %c15_i32_39 = arith.constant 15 : i32
    %62 = tpu.dynamic_rotate %51 by %c15_i32_39 dim 1 : vector<4x512xf32>, i32 -> vector<4x512xf32>
    %c2_40 = arith.constant 2 : index
    %c0_41 = arith.constant 0 : index
    %63 = vector.load %arg2[%c2_40, %c0_41] : memref<9x512xf32, #tpu.memory_space<vmem>>, vector<1x512xf32>
    %64 = vector.broadcast %63 : vector<1x512xf32> to vector<4x512xf32>
    %65 = arith.mulf %62, %64 : vector<4x512xf32>
    %c8_42 = arith.constant 8 : index
    %c0_43 = arith.constant 0 : index
    %66 = vector.load %arg12[%c8_42, %c0_43] : memref<36x512xf32, #tpu.memory_space<vmem>>, vector<4x512xf32>
    tpu.vector_store %arg12[%c8_42, %c0_43], %65 {strides = array<i32>} : memref<36x512xf32, #tpu.memory_space<vmem>>, vector<4x512xf32>,
    %c1_i32_44 = arith.constant 1 : i32
    %67 = tpu.dynamic_rotate %51 by %c1_i32_44 dim 1 : vector<4x512xf32>, i32 -> vector<4x512xf32>
    %c3_45 = arith.constant 3 : index
    %c0_46 = arith.constant 0 : index
    %68 = vector.load %arg2[%c3_45, %c0_46] : memref<9x512xf32, #tpu.memory_space<vmem>>, vector<1x512xf32>
    %69 = vector.broadcast %68 : vector<1x512xf32> to vector<4x512xf32>
    %70 = arith.mulf %67, %69 : vector<4x512xf32>
    %c12_47 = arith.constant 12 : index
    %c0_48 = arith.constant 0 : index
    %71 = vector.load %arg12[%c12_47, %c0_48] : memref<36x512xf32, #tpu.memory_space<vmem>>, vector<4x512xf32>
    tpu.vector_store %arg12[%c12_47, %c0_48], %70 {strides = array<i32>} : memref<36x512xf32, #tpu.memory_space<vmem>>, vector<4x512xf32>,
    %c16_49 = arith.constant 16 : index
    %c0_50 = arith.constant 0 : index
    %72 = vector.load %arg12[%c16_49, %c0_50] : memref<36x512xf32, #tpu.memory_space<vmem>>, vector<4x512xf32>
    tpu.vector_store %arg12[%c16_49, %c0_50], %51 {strides = array<i32>} : memref<36x512xf32, #tpu.memory_space<vmem>>, vector<4x512xf32>,
    %c511_i32_51 = arith.constant 511 : i32
    %73 = tpu.dynamic_rotate %51 by %c511_i32_51 dim 1 : vector<4x512xf32>, i32 -> vector<4x512xf32>
    %c5_52 = arith.constant 5 : index
    %c0_53 = arith.constant 0 : index
    %74 = vector.load %arg2[%c5_52, %c0_53] : memref<9x512xf32, #tpu.memory_space<vmem>>, vector<1x512xf32>
    %75 = vector.broadcast %74 : vector<1x512xf32> to vector<4x512xf32>
    %76 = arith.mulf %73, %75 : vector<4x512xf32>
    %c20_54 = arith.constant 20 : index
    %c0_55 = arith.constant 0 : index
    %77 = vector.load %arg12[%c20_54, %c0_55] : memref<36x512xf32, #tpu.memory_space<vmem>>, vector<4x512xf32>
    tpu.vector_store %arg12[%c20_54, %c0_55], %76 {strides = array<i32>} : memref<36x512xf32, #tpu.memory_space<vmem>>, vector<4x512xf32>,
    %c497_i32_56 = arith.constant 497 : i32
    %78 = tpu.dynamic_rotate %51 by %c497_i32_56 dim 1 : vector<4x512xf32>, i32 -> vector<4x512xf32>
    %c6_57 = arith.constant 6 : index
    %c0_58 = arith.constant 0 : index
    %79 = vector.load %arg2[%c6_57, %c0_58] : memref<9x512xf32, #tpu.memory_space<vmem>>, vector<1x512xf32>
    %80 = vector.broadcast %79 : vector<1x512xf32> to vector<4x512xf32>
    %81 = arith.mulf %78, %80 : vector<4x512xf32>
    %c24_59 = arith.constant 24 : index
    %c0_60 = arith.constant 0 : index
    %82 = vector.load %arg12[%c24_59, %c0_60] : memref<36x512xf32, #tpu.memory_space<vmem>>, vector<4x512xf32>
    tpu.vector_store %arg12[%c24_59, %c0_60], %81 {strides = array<i32>} : memref<36x512xf32, #tpu.memory_space<vmem>>, vector<4x512xf32>,
    %c496_i32_61 = arith.constant 496 : i32
    %83 = tpu.dynamic_rotate %51 by %c496_i32_61 dim 1 : vector<4x512xf32>, i32 -> vector<4x512xf32>
    %c7_62 = arith.constant 7 : index
    %c0_63 = arith.constant 0 : index
    %84 = vector.load %arg2[%c7_62, %c0_63] : memref<9x512xf32, #tpu.memory_space<vmem>>, vector<1x512xf32>
    %85 = vector.broadcast %84 : vector<1x512xf32> to vector<4x512xf32>
    %86 = arith.mulf %83, %85 : vector<4x512xf32>
    %c28_64 = arith.constant 28 : index
    %c0_65 = arith.constant 0 : index
    %87 = vector.load %arg12[%c28_64, %c0_65] : memref<36x512xf32, #tpu.memory_space<vmem>>, vector<4x512xf32>
    tpu.vector_store %arg12[%c28_64, %c0_65], %86 {strides = array<i32>} : memref<36x512xf32, #tpu.memory_space<vmem>>, vector<4x512xf32>,
    %c495_i32_66 = arith.constant 495 : i32
    %88 = tpu.dynamic_rotate %51 by %c495_i32_66 dim 1 : vector<4x512xf32>, i32 -> vector<4x512xf32>
    %c8_67 = arith.constant 8 : index
    %c0_68 = arith.constant 0 : index
    %89 = vector.load %arg2[%c8_67, %c0_68] : memref<9x512xf32, #tpu.memory_space<vmem>>, vector<1x512xf32>
    %90 = vector.broadcast %89 : vector<1x512xf32> to vector<4x512xf32>
    %91 = arith.mulf %88, %90 : vector<4x512xf32>
    %c32_69 = arith.constant 32 : index
    %c0_70 = arith.constant 0 : index
    %92 = vector.load %arg12[%c32_69, %c0_70] : memref<36x512xf32, #tpu.memory_space<vmem>>, vector<4x512xf32>
    tpu.vector_store %arg12[%c32_69, %c0_70], %91 {strides = array<i32>} : memref<36x512xf32, #tpu.memory_space<vmem>>, vector<4x512xf32>,
    %c0_71 = arith.constant 0 : index
    %c0_72 = arith.constant 0 : index
    %93 = vector.load %arg12[%c0_71, %c0_72] : memref<36x512xf32, #tpu.memory_space<vmem>>, vector<36x512xf32>
    %c0_73 = arith.constant 0 : index
    %c0_74 = arith.constant 0 : index
    %94 = vector.load %arg5[%c0_73, %c0_74] : memref<8x36xf32, #tpu.memory_space<vmem>>, vector<8x36xf32>
    %cst_75 = arith.constant dense<0.000000e+00> : vector<8x512xf32>
    %95 = tpu.matmul %94, %93, %cst_75 {dimension_numbers = #tpu.dot_dimension_numbers<[1], [0], [0], [1], [0, 0, 1, 1], [], []>} : vector<8x36xf32>, vector<36x512xf32>, vector<8x512xf32> -> vector<8x512xf32>
    %c0_76 = arith.constant 0 : index
    %c0_77 = arith.constant 0 : index
    %96 = vector.load %arg6[%c0_76, %c0_77] : memref<8x1xf32, #tpu.memory_space<vmem>>, vector<8x1xf32>
    %97 = vector.broadcast %96 : vector<8x1xf32> to vector<8x512xf32>
    %98 = arith.addf %95, %97 : vector<8x512xf32>
    %c0_78 = arith.constant 0 : index
    %c0_79 = arith.constant 0 : index
    %99 = vector.load %arg7[%c0_78, %c0_79] : memref<8x4xf32, #tpu.memory_space<vmem>>, vector<8x4xf32>
    %cst_80 = arith.constant dense<0.000000e+00> : vector<8x512xf32>
    %100 = tpu.matmul %99, %0, %cst_80 {dimension_numbers = #tpu.dot_dimension_numbers<[1], [0], [0], [1], [0, 0, 1, 1], [], []>} : vector<8x4xf32>, vector<4x512xf32>, vector<8x512xf32> -> vector<8x512xf32>
    %c0_81 = arith.constant 0 : index
    %c0_82 = arith.constant 0 : index
    %101 = vector.load %arg8[%c0_81, %c0_82] : memref<8x1xf32, #tpu.memory_space<vmem>>, vector<8x1xf32>
    %102 = vector.broadcast %101 : vector<8x1xf32> to vector<8x512xf32>
    %103 = arith.addf %100, %102 : vector<8x512xf32>
    %104 = arith.addf %98, %103 : vector<8x512xf32>
    %c0_83 = arith.constant 0 : index
    %c0_84 = arith.constant 0 : index
    %105 = vector.load %arg9[%c0_83, %c0_84] : memref<512x128xf32, #tpu.memory_space<vmem>>, vector<512x128xf32>
    %cst_85 = arith.constant dense<0.000000e+00> : vector<8x128xf32>
    %106 = tpu.matmul %104, %105, %cst_85 {dimension_numbers = #tpu.dot_dimension_numbers<[1], [0], [0], [1], [0, 0, 1, 1], [], []>} : vector<8x512xf32>, vector<512x128xf32>, vector<8x128xf32> -> vector<8x128xf32>
    %c0_86 = arith.constant 0 : index
    %c0_87 = arith.constant 0 : index
    %107 = vector.load %arg10[%c0_86, %c0_87] : memref<8x128xf32, #tpu.memory_space<vmem>>, vector<8x128xf32>
    tpu.vector_store %arg10[%c0_86, %c0_87], %106 {strides = array<i32>} : memref<8x128xf32, #tpu.memory_space<vmem>>, vector<8x128xf32>,
    return
  }
  func.func @transform_0(%arg0: i32) -> (i32, i32) {
    %c0_i32 = arith.constant 0 : i32
    %c0_i32_0 = arith.constant 0 : i32
    %c0_i32_1 = arith.constant 0 : i32
    return %c0_i32, %c0_i32_0 : i32, i32
  }
  func.func @transform_1(%arg0: i32) -> (i32, i32) {
    %c0_i32 = arith.constant 0 : i32
    %c0_i32_0 = arith.constant 0 : i32
    %c0_i32_1 = arith.constant 0 : i32
    return %c0_i32, %c0_i32_0 : i32, i32
  }
  func.func @transform_2(%arg0: i32) -> (i32, i32) {
    %c0_i32 = arith.constant 0 : i32
    %c0_i32_0 = arith.constant 0 : i32
    %c0_i32_1 = arith.constant 0 : i32
    return %c0_i32, %c0_i32_0 : i32, i32
  }
  func.func @transform_3(%arg0: i32) -> (i32, i32) {
    %c0_i32 = arith.constant 0 : i32
    %c0_i32_0 = arith.constant 0 : i32
    %c0_i32_1 = arith.constant 0 : i32
    return %c0_i32, %c0_i32_0 : i32, i32
  }
  func.func @transform_4(%arg0: i32) -> (i32, i32) {
    %c0_i32 = arith.constant 0 : i32
    %c0_i32_0 = arith.constant 0 : i32
    %c0_i32_1 = arith.constant 0 : i32
    return %c0_i32, %c0_i32_0 : i32, i32
  }
  func.func @transform_5(%arg0: i32) -> (i32, i32) {
    %c0_i32 = arith.constant 0 : i32
    %c0_i32_0 = arith.constant 0 : i32
    %c0_i32_1 = arith.constant 0 : i32
    return %c0_i32, %c0_i32_0 : i32, i32
  }
  func.func @transform_6(%arg0: i32) -> (i32, i32) {
    %c0_i32 = arith.constant 0 : i32
    %c0_i32_0 = arith.constant 0 : i32
    %c0_i32_1 = arith.constant 0 : i32
    return %c0_i32, %c0_i32_0 : i32, i32
  }
  func.func @transform_7(%arg0: i32) -> (i32, i32) {
    %c0_i32 = arith.constant 0 : i32
    %c0_i32_0 = arith.constant 0 : i32
    %c0_i32_1 = arith.constant 0 : i32
    return %c0_i32, %c0_i32_0 : i32, i32
  }
  func.func @transform_8(%arg0: i32) -> (i32, i32) {
    %c0_i32 = arith.constant 0 : i32
    %c0_i32_0 = arith.constant 0 : i32
    %c0_i32_1 = arith.constant 0 : i32
    return %c0_i32, %c0_i32_0 : i32, i32
  }
  func.func @transform_9(%arg0: i32) -> (i32, i32) {
    %c0_i32 = arith.constant 0 : i32
    %c0_i32_0 = arith.constant 0 : i32
    %c0_i32_1 = arith.constant 0 : i32
    return %c0_i32, %c0_i32_0 : i32, i32
  }
}

</mosaic_0001>

<bundles_post_ra>
// kernel: tpu_custom_call.1
= control target key start
LH: loop header
LB: loop body
LE: loop exit
PB: predicated region body
PF: predicated region fallthrough
CT: control target
= control target key end

     0   :  { %14 = vsyncpa [#allocation5], 0  ;;  %s2207_s0 = inlined_call_operand.vmem [shape: f32[4,512], index: 0, kind: input, shape index: {}]   ;;  %s2208_s1 = inlined_call_operand.hbm [shape: f32[9,512], index: 1, kind: input, shape index: {}]   ;;  %s2209_s2 = inlined_call_operand.vmem [shape: f32[4,36], index: 2, kind: input, shape index: {}]   ;;  %s2210_s3 = inlined_call_operand.vmem [shape: f32[4,1], index: 3, kind: input, shape index: {}]   ;;  %s2211_s4 = inlined_call_operand.vmem [shape: f32[8,36], index: 4, kind: input, shape index: {}]   ;;  %s2212_s5 = inlined_call_operand.vmem [shape: f32[8,1], index: 5, kind: input, shape index: {}]   ;;  %s2213_s6 = inlined_call_operand.vmem [shape: f32[8,4], index: 6, kind: input, shape index: {}]   ;;  %s2214_s7 = inlined_call_operand.vmem [shape: f32[8,1], index: 7, kind: input, shape index: {}]   ;;  %s2215_s8 = inlined_call_operand.hbm [shape: f32[512,128], index: 8, kind: input, shape index: {}]   ;;  %s2216_s9 = inlined_call_operand.hbm [shape: f32[8,128], index: 9, kind: output, shape index: {}]  }
   0x1   :  { %15 = vsyncpa [#allocation8], 0 }
   0x2   :  { %16 = vsyncpa [#allocation6], 0  ;;  %s1805_s30 = smov [#allocation4]  }
   0x3   :  { %s24_s10 = sshll.u32 %s1805_s30, 4  ;;  %s25_s10 = int_to_ptr.vmem [resolvable:$true] %s24_s10 }
   0x4   :  { %s1747_s11 = scalar_lea.vmem %s25_s10, 1024  ;;  %p1752_p1 = scmp.lt.s32.totalorder %s25_s10, %s25_s10 }
   0x5   :  { %p1748_p0 = scmp.ne.s32.totalorder %s25_s10, %s1747_s11  ;;  %p1753_p2 = scmp.lt.s32.totalorder %s1747_s11, %s1747_s11 }
   0x7   :  { %p1754_p3 = por %p1753_p2, %p1752_p1 }
   0x9   :  { %p1755_p4 = pnand %p1754_p3, %p1748_p0 }
   0xb   :  { %1758 = shalt.err (!%p1755_p4)
}
   0xc   :  { %s1806_s12 = smov 512   ;;  %s1807_s13 = smov 32  }
   0xd   :  { %30 = dma.hbm_to_vmem [thread:$0]  %s2208_s1, 1024, %s25_s10, [#allocation5], %s1806_s12, %s1806_s12, %s1807_s13  }
   0xe   :  { %s1808_s16 = smov [#allocation7]  }
   0xf   :  { %s48_s17 = sshll.u32 %s1808_s16, 4  ;;  %s49_s17 = int_to_ptr.vmem [resolvable:$true] %s48_s17 }
  0x10   :  { %s1767_s18 = scalar_lea.vmem %s49_s17, 8192  ;;  %p1772_p6 = scmp.lt.s32.totalorder %s49_s17, %s49_s17 }
  0x11   :  { %p1768_p5 = scmp.ne.s32.totalorder %s49_s17, %s1767_s18  ;;  %p1773_p7 = scmp.lt.s32.totalorder %s1767_s18, %s1767_s18 }
  0x13   :  { %p1774_p8 = por %p1773_p7, %p1772_p6 }
  0x15   :  { %p1775_p9 = pnand %p1774_p8, %p1768_p5 }
  0x17   :  { %1778 = shalt.err (!%p1775_p9)
}
  0x18   :  { %s1809_s19 = smov 128   ;;  %s1810_s20 = smov 8  }
  0x19   :  { %54 = dma.hbm_to_vmem [thread:$0]  %s2215_s8, 8192, %s49_s17, [#allocation8], %s1809_s19, %s1809_s19, %s1810_s20  }
  0x1a   :  { %1799 = dma.done.wait [#allocation5], 1024  }
  0x1b   :  { %1800 = vsyncadd [#allocation5], 4294966272 }
  0x1c   :  { %1801 = dma.done.wait [#allocation8], 8192  }
  0x1d   :  { %1802 = vsyncadd [#allocation8], 4294959104  ;;  %v62_v0 = vld [vmem:[%s2207_s0 + $0x8] sm:$0xff]  ;;  %v61_v1 = vld [vmem:[%s2207_s0] sm:$0xff]  ;;  %s1811_s26 = smov 112   ;;  %s1812_s8 = smov 111   ;;  %v79_v9 = vlaneseq }
  0x1e   :  { %v64_v2 = vmax.f32 %v62_v0, 0.0  ;;  %v63_v3 = vmax.f32 %v61_v1, 0.0  ;;  %s1813_s27 = smov 127   ;;  %s1814_s28 = smov 113   ;;  %v1819_v6 = vmov 0.0   ;;  %v1820_v7 = vmov 0  }
  0x1f   :  { %s1815_s29 = smov 1   ;;  %s1816_s30 = smov 16   ;;  %584 = vmatprep.mubr.f32.mxu0 %v1819_v6  ;;  %655 = vmatprep.mubr.f32.mxu1 %v1819_v6  ;;  %v497_v8 = vld [vmem:[%s2210_s3] sm:$0xf]  ;;  %v89_v10 = vshrl.u32 %v79_v9, 7  ;;  %v1921_v11 = vand.u32 127, %v79_v9 }
  0x20   :  { %380 = vrot.lane.b32.xlu1 %v64_v2, %s1811_s26  ;;  %274 = vst [vmem:[#allocation2 + $0x28] sm:$0xf] %v64_v2  ;;  %376 = vrot.lane.b32.xlu0 %v63_v3, %s1811_s26  ;;  %272 = vst [vmem:[#allocation2 + $0x8] sm:$0xf] %v63_v3  ;;  %v68_v4 = vcombine.high %v64_v2, %v64_v2  ;;  %v67_v5 = vcombine.high %v63_v3, %v63_v3  ;;  %s1817_s10 = smov 15   ;;  %s1818_s11 = smov 17  }
  0x21   :  { %1733 = vset.pattern.permute.xlu0 %v1820_v7  ;;  %1734 = vset.pattern.permute.xlu1 %v1820_v7  ;;  %v1923_v12 = vsub.s32 2, %v89_v10  ;;  %v1925_v13 = vsub.s32 3, %v89_v10  ;;  %v390_v14 = vld [vmem:[#allocation4 + $0x7] ss:$8 sm:$0xf]  ;;  %v1927_v17 = vsub.s32 0, %v89_v10 }
  0x22   :  { %275 = vst [vmem:[#allocation2 + $0x40] sm:$0xf] %v68_v4  ;;  %273 = vst [vmem:[#allocation2 + $0x88] sm:$0xf] %v67_v5  ;;  %v1929_v18 = vsub.s32 1, %v89_v10  ;;  %vm384_vm0 = vcmp.lt.s32.totalorder %v1921_v11, 112 }
  0x23   :  { %v403_v19 = vrot.slane %v390_v14, %v1923_v12  ;;  %v407_v20 = vrot.slane %v390_v14, %v1925_v13  ;;  %v446_v21 = vld [vmem:[#allocation4 + $0x20] ss:$8 sm:$0xf]  ;;  %vm440_vm1 = vcmp.lt.s32.totalorder %v1921_v11, 111  ;;  %v395_v41 = vrot.slane %v390_v14, %v1927_v17 }
  0x24   :  { %382 = vrot.lane.b32.xlu1 %v68_v4, %s1811_s26  ;;  %432 = vrot.lane.b32.xlu0 %v63_v3, %s1812_s8  ;;  %v451_v28 = vrot.slane %v446_v21, %v1927_v17  ;;  %v455_v29 = vrot.slane %v446_v21, %v1929_v18  ;;  %v459_v36 = vrot.slane %v446_v21, %v1923_v12  ;;  %v290_v38 = vld [vmem:[#allocation4 + $0x5] ss:$8 sm:$0xf]  ;;  %vm284_vm2 = vcmp.lt.s32.totalorder %v1921_v11, 127 }
  0x25   :  { %v463_v37 = vrot.slane %v446_v21, %v1925_v13  ;;  %v399_v42 = vrot.slane %v390_v14, %v1929_v18  ;;  %v295_v45 = vrot.slane %v290_v38, %v1927_v17  ;;  %vm507_vm3 = vcmask 1043456   ;;  %v346_v63 = vld [vmem:[#allocation4 + $0x6] ss:$8 sm:$0xf] }
  0x26   :  { %v307_v60 = vrot.slane %v290_v38, %v1925_v13  ;;  %v299_v61 = vrot.slane %v290_v38, %v1929_v18  ;;  %v303_v62 = vrot.slane %v290_v38, %v1923_v12  ;;  %vm340_vm4 = vcmp.lt.s32.totalorder %v1921_v11, 113 }
  0x27   :  { %vm224_vm5 = vcmp.lt.s32.totalorder %v1921_v11, 1  ;;  %vm124_vm6 = vcmp.lt.s32.totalorder %v1921_v11, 16  ;;  %vm180_vm7 = vcmp.lt.s32.totalorder %v1921_v11, 15  ;;  %vm81_vm8 = vcmp.lt.s32.totalorder %v1921_v11, 17  ;;  %v1737_v11 = vld [vmem:[%s2207_s0] sm:$0xff] }
  0x28   :  { %436 = vrot.lane.b32.xlu0 %v64_v2, %s1812_s8  ;;  %434 = vrot.lane.b32.xlu1 %v67_v5, %s1812_s8  ;;  %vm503_vm9 = vcmask 293888   ;;  %vm1249_vm10 = vcmask 31744  }
  0x2c   :  { %438 = vrot.lane.b32.xlu1 %v68_v4, %s1812_s8  ;;  %378 = vrot.lane.b32.xlu0 %v67_v5, %s1811_s26 }
  0x30   :  { %278 = vrot.lane.b32.xlu1 %v67_v5, %s1813_s27  ;;  %276 = vrot.lane.b32.xlu0 %v63_v3, %s1813_s27 }
  0x34   :  { %282 = vrot.lane.b32.xlu1 %v68_v4, %s1813_s27  ;;  %280 = vrot.lane.b32.xlu0 %v64_v2, %s1813_s27 }
  0x38   :  { %334 = vrot.lane.b32.xlu1 %v67_v5, %s1814_s28  ;;  %332 = vrot.lane.b32.xlu0 %v63_v3, %s1814_s28 }
  0x3c   :  { %338 = vrot.lane.b32.xlu1 %v68_v4, %s1814_s28  ;;  %336 = vrot.lane.b32.xlu0 %v64_v2, %s1814_s28 }
  0x40   :  { %218 = vrot.lane.b32.xlu1 %v67_v5, %s1815_s29  ;;  %216 = vrot.lane.b32.xlu0 %v63_v3, %s1815_s29 }
  0x44   :  { %222 = vrot.lane.b32.xlu1 %v68_v4, %s1815_s29  ;;  %220 = vrot.lane.b32.xlu0 %v64_v2, %s1815_s29 }
  0x48   :  { %118 = vrot.lane.b32.xlu1 %v67_v5, %s1816_s30  ;;  %116 = vrot.lane.b32.xlu0 %v63_v3, %s1816_s30 }
  0x4c   :  { %122 = vrot.lane.b32.xlu1 %v68_v4, %s1816_s30  ;;  %120 = vrot.lane.b32.xlu0 %v64_v2, %s1816_s30 }
  0x50   :  { %174 = vrot.lane.b32.xlu1 %v67_v5, %s1817_s10  ;;  %172 = vrot.lane.b32.xlu0 %v63_v3, %s1817_s10 }
  0x54   :  { %178 = vrot.lane.b32.xlu1 %v68_v4, %s1817_s10  ;;  %176 = vrot.lane.b32.xlu0 %v64_v2, %s1817_s10 }
  0x58   :  { %73 = vrot.lane.b32.xlu1 %v67_v5, %s1818_s11  ;;  %71 = vrot.lane.b32.xlu0 %v63_v3, %s1818_s11 }
  0x5c   :  { %77 = vrot.lane.b32.xlu1 %v68_v4, %s1818_s11  ;;  %75 = vrot.lane.b32.xlu0 %v64_v2, %s1818_s11 }
  0x60   :  { %500 = vperm.xlu0 %1733, %v497_v8  }
  0x92   :  { %v381_v15 = vpop.permute.xlu1 %380  ;;  %v377_v16 = vpop.permute.xlu0 %376 }
  0x96   :  { %v383_v22 = vpop.permute.xlu1 %382  ;;  %v433_v23 = vpop.permute.xlu0 %432 }
  0x97   :  { %v385_v24 = vsel %vm384_vm0, %v381_v15, %v383_v22  ;;  %v388_v25 = vsel %vm384_vm0, %v383_v22, %v377_v16 }
  0x98   :  { %v414_v26 = vmul.f32 %v403_v19, %v385_v24  ;;  %v415_v27 = vmul.f32 %v407_v20, %v388_v25 }
  0x9a   :  { %v422_v30 = vrot.slane %v414_v26, 4  ;;  %v423_v31 = vrot.slane %v415_v27, 4  ;;  %v437_v32 = vpop.permute.xlu0 %436  ;;  %v435_v33 = vpop.permute.xlu1 %434  ;;  %v363_v27 = vrot.slane %v346_v63, %v1925_v13 }
  0x9b   :  { %v442_v34 = vsel %vm440_vm1, %v435_v33, %v437_v32  ;;  %v443_v35 = vsel %vm440_vm1, %v433_v23, %v435_v33 }
  0x9c   :  { %430 = vst [vmem:[#allocation2 + $0x98] sm:$0xf0] %v422_v30  ;;  %431 = vst [vmem:[#allocation2 + $0x60] sm:$0xf0] %v423_v31  ;;  %v468_v39 = vmul.f32 %v451_v28, %v443_v35  ;;  %v469_v40 = vmul.f32 %v455_v29, %v442_v34  ;;  %v355_v28 = vrot.slane %v346_v63, %v1929_v18 }
  0x9d   :  { %v359_v29 = vrot.slane %v346_v63, %v1923_v12  ;;  %v230_v30 = vld [vmem:[#allocation4 + $0x3] ss:$8 sm:$0xf] }
  0x9e   :  { %472 = vst [vmem:[#allocation2 + $0x20] sm:$0xf] %v468_v39  ;;  %473 = vst [vmem:[#allocation2 + $0x48] sm:$0xf] %v469_v40  ;;  %v439_v43 = vpop.permute.xlu1 %438  ;;  %v379_v44 = vpop.permute.xlu0 %378  ;;  %v239_v39 = vrot.slane %v230_v30, %v1929_v18 }
  0x9f   :  { %v441_v46 = vsel %vm440_vm1, %v437_v32, %v439_v43  ;;  %v444_v47 = vsel %vm440_vm1, %v439_v43, %v433_v23  ;;  %v386_v48 = vsel %vm384_vm0, %v379_v44, %v381_v15  ;;  %v387_v49 = vsel %vm384_vm0, %v377_v16, %v379_v44 }
  0xa0   :  { %v470_v50 = vmul.f32 %v459_v36, %v441_v46  ;;  %v471_v51 = vmul.f32 %v463_v37, %v444_v47  ;;  %v412_v52 = vmul.f32 %v395_v41, %v387_v49  ;;  %v413_v53 = vmul.f32 %v399_v42, %v386_v48  ;;  %v130_v47 = vld [vmem:[#allocation4 + $0x1] ss:$8 sm:$0xf] }
  0xa1   :  { %v351_v15 = vrot.slane %v346_v63, %v1927_v17  ;;  %v235_v44 = vrot.slane %v230_v30, %v1927_v17  ;;  %v247_v46 = vrot.slane %v230_v30, %v1925_v13 }
  0xa2   :  { %474 = vst [vmem:[#allocation2 + $0x70] sm:$0xf] %v470_v50  ;;  %475 = vst [vmem:[#allocation2 + $0x90] sm:$0xf] %v471_v51  ;;  %v420_v54 = vrot.slane %v412_v52, 4  ;;  %v421_v55 = vrot.slane %v413_v53, 4  ;;  %v279_v56 = vpop.permute.xlu1 %278  ;;  %v277_v57 = vpop.permute.xlu0 %276 }
  0xa3   :  { %v287_v58 = vsel %vm284_vm2, %v277_v57, %v279_v56 }
  0xa4   :  { %428 = vst [vmem:[#allocation2 + $0x58] sm:$0xf0] %v420_v54  ;;  %429 = vst [vmem:[#allocation2 + $0x10] sm:$0xf0] %v421_v55  ;;  %v312_v59 = vmul.f32 %v295_v45, %v287_v58  ;;  %v243_v45 = vrot.slane %v230_v30, %v1923_v12 }
  0xa5   :  { %v493_v0 = vld [vmem:[#allocation2 + $0x48] sm:$0xf]  ;;  %v492_v1 = vld [vmem:[#allocation2 + $0x20] sm:$0xf] }
  0xa6   :  { %v320_v2 = vrot.slane %v312_v59, 4  ;;  %1628 = vmatprep.subr.msk.mxu0 %vm507_vm3, %v493_v0  ;;  %v283_v3 = vpop.permute.xlu1 %282  ;;  %v281_v4 = vpop.permute.xlu0 %280 }
  0xa7   :  { %v288_v5 = vsel %vm284_vm2, %v283_v3, %v277_v57  ;;  %v285_v7 = vsel %vm284_vm2, %v281_v4, %v283_v3  ;;  %v286_v8 = vsel %vm284_vm2, %v279_v56, %v281_v4  ;;  %1629 = vmatpush1.msk.msra.mxu0 %vm507_vm3, %v492_v1  ;;  %v139_v57 = vrot.slane %v130_v47, %v1929_v18 }
  0xa8   :  { %328 = vst [vmem:[#allocation2 + $0x8] sm:$0xf0] %v320_v2  ;;  %v315_v9 = vmul.f32 %v307_v60, %v288_v5  ;;  %v313_v10 = vmul.f32 %v299_v61, %v286_v8  ;;  %v314_v14 = vmul.f32 %v303_v62, %v285_v7  ;;  %v135_v7 = vrot.slane %v130_v47, %v1927_v17 }
  0xa9   :  { %v495_v16 = vld [vmem:[#allocation2 + $0x90] sm:$0xf] }
  0xaa   :  { %v494_v19 = vld [vmem:[#allocation2 + $0x70] sm:$0xf]  ;;  %v323_v20 = vrot.slane %v315_v9, 4  ;;  %v321_v21 = vrot.slane %v313_v10, 4  ;;  %v322_v22 = vrot.slane %v314_v14, 4  ;;  %1631 = vmatprep.subr.msk.mxu1 %vm507_vm3, %v495_v16  ;;  %v335_v23 = vpop.permute.xlu1 %334  ;;  %v333_v24 = vpop.permute.xlu0 %332  ;;  %v143_v14 = vrot.slane %v130_v47, %v1923_v12 }
  0xab   :  { %v343_v25 = vsel %vm340_vm4, %v333_v24, %v335_v23  ;;  %1632 = vmatpush1.msk.msra.mxu1 %vm507_vm3, %v494_v19  ;;  %v186_v16 = vld [vmem:[#allocation4 + $0x2] ss:$8 sm:$0xf] }
  0xac   :  { %331 = vst [vmem:[#allocation2 + $0x40] sm:$0xf0] %v323_v20  ;;  %329 = vst [vmem:[#allocation2 + $0x88] sm:$0xf0] %v321_v21  ;;  %v368_v26 = vmul.f32 %v351_v15, %v343_v25  ;;  %v147_v15 = vrot.slane %v130_v47, %v1925_v13 }
  0xad   :  { %330 = vst [vmem:[#allocation2 + $0x28] sm:$0xf0] %v322_v22 }
  0xae   :  { %372 = vst [vmem:[#allocation2 + $0x58] sm:$0xf] %v368_v26  ;;  %v339_v31 = vpop.permute.xlu1 %338  ;;  %v337_v32 = vpop.permute.xlu0 %336 }
  0xaf   :  { %v344_v33 = vsel %vm340_vm4, %v339_v31, %v333_v24  ;;  %v341_v34 = vsel %vm340_vm4, %v337_v32, %v339_v31  ;;  %v342_v35 = vsel %vm340_vm4, %v335_v23, %v337_v32  ;;  %v484_v9 = vld [vmem:[#allocation2 + $0x8] sm:$0xff] }
  0xb0   :  { %v371_v36 = vmul.f32 %v363_v27, %v344_v33  ;;  %v369_v37 = vmul.f32 %v355_v28, %v342_v35  ;;  %v370_v38 = vmul.f32 %v359_v29, %v341_v34  ;;  %v195_v28 = vrot.slane %v186_v16, %v1929_v18 }
  0xb2   :  { %375 = vst [vmem:[#allocation2 + $0x60] sm:$0xf] %v371_v36  ;;  %373 = vst [vmem:[#allocation2 + $0x10] sm:$0xf] %v369_v37  ;;  %v219_v40 = vpop.permute.xlu1 %218  ;;  %v217_v41 = vpop.permute.xlu0 %216  ;;  %v191_v36 = vrot.slane %v186_v16, %v1927_v17  ;;  %v199_v37 = vrot.slane %v186_v16, %v1923_v12 }
  0xb3   :  { %374 = vst [vmem:[#allocation2 + $0x98] sm:$0xf] %v370_v38  ;;  %v227_v42 = vsel %vm224_vm5, %v217_v41, %v219_v40  ;;  %v485_v4 = vld [vmem:[#allocation2 + $0x88] sm:$0xff]  ;;  %v487_v5 = vld [vmem:[#allocation2 + $0x40] sm:$0xff]  ;;  %v203_v38 = vrot.slane %v186_v16, %v1925_v13 }
  0xb4   :  { %v253_v43 = vmul.f32 %v239_v39, %v227_v42  ;;  %v486_v10 = vld [vmem:[#allocation2 + $0x28] sm:$0xff] }
  0xb5   :  { %v488_v2 = vld [vmem:[#allocation2 + $0x58] sm:$0xff] }
  0xb6   :  { %v261_v48 = vrot.slane %v253_v43, 4  ;;  %v223_v49 = vpop.permute.xlu1 %222  ;;  %v221_v50 = vpop.permute.xlu0 %220  ;;  %v86_v39 = vld [vmem:[#allocation4] ss:$8 sm:$0xf] }
  0xb7   :  { %v228_v51 = vsel %vm224_vm5, %v223_v49, %v217_v41  ;;  %v225_v52 = vsel %vm224_vm5, %v221_v50, %v223_v49  ;;  %v226_v53 = vsel %vm224_vm5, %v219_v40, %v221_v50 }
  0xb8   :  { %269 = vst [vmem:[#allocation2 + $0x68] sm:$0xf0] %v261_v48  ;;  %v252_v54 = vmul.f32 %v235_v44, %v228_v51  ;;  %v254_v55 = vmul.f32 %v243_v45, %v226_v53  ;;  %v255_v56 = vmul.f32 %v247_v46, %v225_v52  ;;  %v95_v48 = vrot.slane %v86_v39, %v1929_v18 }
  0xb9   :  { %v489_v58 = vld [vmem:[#allocation2 + $0x10] sm:$0xff]  ;;  %v491_v59 = vld [vmem:[#allocation2 + $0x60] sm:$0xff]  ;;  %v91_v53 = vrot.slane %v86_v39, %v1927_v17 }
  0xba   :  { %v490_v60 = vld [vmem:[#allocation2 + $0x98] sm:$0xff]  ;;  %v260_v61 = vrot.slane %v252_v54, 4  ;;  %v262_v62 = vrot.slane %v254_v55, 4  ;;  %v263_v63 = vrot.slane %v255_v56, 4  ;;  %v119_v0 = vpop.permute.xlu1 %118  ;;  %544 = vmatprep.subr.mxu0 %v489_v58  ;;  %615 = vmatprep.subr.mxu1 %v491_v59  ;;  %v117_v1 = vpop.permute.xlu0 %116  ;;  %v99_v54 = vrot.slane %v86_v39, %v1923_v12 }
  0xbb   :  { %v127_v3 = vsel %vm124_vm6, %v117_v1, %v119_v0  ;;  %545 = vmatpush1.msra.mxu0 %v488_v2  ;;  %616 = vmatpush1.msra.mxu1 %v490_v60  ;;  %v103_v55 = vrot.slane %v86_v39, %v1925_v13 }
  0xbc   :  { %268 = vst [vmem:[#allocation2 + $0x30] sm:$0xf0] %v260_v61  ;;  %270 = vst [vmem:[#allocation2 + $0x78] sm:$0xf0] %v262_v62  ;;  %v153_v8 = vmul.f32 %v139_v57, %v127_v3  ;;  %546 = vmatprep.subr.mxu0 %v485_v4  ;;  %617 = vmatprep.subr.mxu1 %v487_v5  ;;  %v496_v5 = vld [vmem:[%s2209_s2] sm:$0xf] }
  0xbd   :  { %271 = vst [vmem:[#allocation2 + $0x80] sm:$0xf0] %v263_v63  ;;  %547 = vmatpush1.msra.mxu0 %v484_v9  ;;  %618 = vmatpush1.msra.mxu1 %v486_v10 }
  0xbe   :  { %v161_v19 = vrot.slane %v153_v8, 4  ;;  %v123_v20 = vpop.permute.xlu1 %122  ;;  %v121_v21 = vpop.permute.xlu0 %120 }
  0xbf   :  { %v128_v22 = vsel %vm124_vm6, %v123_v20, %v117_v1  ;;  %v125_v23 = vsel %vm124_vm6, %v121_v21, %v123_v20  ;;  %v126_v24 = vsel %vm124_vm6, %v119_v0, %v121_v21 }
  0xc0   :  { %169 = vst [vmem:[#allocation2 + $0x38] sm:$0xf0] %v161_v19  ;;  %v152_v25 = vmul.f32 %v135_v7, %v128_v22  ;;  %v154_v26 = vmul.f32 %v143_v14, %v126_v24  ;;  %v155_v27 = vmul.f32 %v147_v15, %v125_v23 }
  0xc2   :  { %v160_v29 = vrot.slane %v152_v25, 4  ;;  %v162_v30 = vrot.slane %v154_v26, 4  ;;  %v163_v31 = vrot.slane %v155_v27, 4  ;;  %v175_v32 = vpop.permute.xlu1 %174  ;;  %v173_v33 = vpop.permute.xlu0 %172 }
  0xc3   :  { %v183_v34 = vsel %vm180_vm7, %v173_v33, %v175_v32 }
  0xc4   :  { %168 = vst [vmem:[#allocation2] sm:$0xf0] %v160_v29  ;;  %170 = vst [vmem:[#allocation2 + $0x50] sm:$0xf0] %v162_v30  ;;  %v209_v35 = vmul.f32 %v195_v28, %v183_v34  ;;  %v1075_v28 = vld [vmem:[%s2212_s5] sm:$0xff] }
  0xc5   :  { %171 = vst [vmem:[#allocation2 + $0x18] sm:$0xf0] %v163_v31  ;;  %v1239_v29 = vld [vmem:[%s2214_s7] sm:$0xff] }
  0xc6   :  { %213 = vst [vmem:[#allocation2 + $0x68] sm:$0xf] %v209_v35  ;;  %v179_v40 = vpop.permute.xlu1 %178  ;;  %v177_v41 = vpop.permute.xlu0 %176  ;;  %v970_v30 = vld [vmem:[#allocation4 + $0x7] ss:$8 sm:$0xf] }
  0xc7   :  { %v184_v42 = vsel %vm180_vm7, %v179_v40, %v173_v33  ;;  %v181_v43 = vsel %vm180_vm7, %v177_v41, %v179_v40  ;;  %v182_v44 = vsel %vm180_vm7, %v175_v32, %v177_v41  ;;  %v975_v33 = vrot.slane %v970_v30, %v1927_v17 }
  0xc8   :  { %v208_v45 = vmul.f32 %v191_v36, %v184_v42  ;;  %v210_v46 = vmul.f32 %v199_v37, %v182_v44  ;;  %v211_v47 = vmul.f32 %v203_v38, %v181_v43  ;;  %v979_v34 = vrot.slane %v970_v30, %v1929_v18  ;;  %v1024_v43 = vld [vmem:[#allocation4 + $0x20] ss:$8 sm:$0xf] }
  0xc9   :  { %v983_v41 = vrot.slane %v970_v30, %v1923_v12  ;;  %v987_v42 = vrot.slane %v970_v30, %v1925_v13 }
  0xca   :  { %212 = vst [vmem:[#allocation2 + $0x30] sm:$0xf] %v208_v45  ;;  %214 = vst [vmem:[#allocation2 + $0x78] sm:$0xf] %v210_v46  ;;  %v74_v49 = vpop.permute.xlu1 %73  ;;  %v72_v50 = vpop.permute.xlu0 %71 }
  0xcb   :  { %215 = vst [vmem:[#allocation2 + $0x80] sm:$0xf] %v211_v47  ;;  %v84_v51 = vsel %vm81_vm8, %v72_v50, %v74_v49 }
  0xcc   :  { %v109_v52 = vmul.f32 %v95_v48, %v84_v51 }
  0xcd   :  { %v481_v56 = vld [vmem:[#allocation2 + $0x68] sm:$0xff] }
  0xce   :  { %113 = vst [vmem:[#allocation2 + $0x38] sm:$0xf] %v109_v52  ;;  %v78_v57 = vpop.permute.xlu1 %77  ;;  %v76_v58 = vpop.permute.xlu0 %75  ;;  %548 = vmatprep.subr.mxu0 %v481_v56  ;;  %v1029_v52 = vrot.slane %v1024_v43, %v1927_v17 }
  0xcf   :  { %v85_v59 = vsel %vm81_vm8, %v78_v57, %v72_v50  ;;  %v82_v60 = vsel %vm81_vm8, %v76_v58, %v78_v57  ;;  %v83_v61 = vsel %vm81_vm8, %v74_v49, %v76_v58 }
  0xd0   :  { %v108_v62 = vmul.f32 %v91_v53, %v85_v59  ;;  %v110_v63 = vmul.f32 %v99_v54, %v83_v61  ;;  %v111_v0 = vmul.f32 %v103_v55, %v82_v60  ;;  %v1033_v53 = vrot.slane %v1024_v43, %v1929_v18 }
  0xd1   :  { %v480_v1 = vld [vmem:[#allocation2 + $0x30] sm:$0xff]  ;;  %v482_v3 = vld [vmem:[#allocation2 + $0x78] sm:$0xff] }
  0xd2   :  { %v483_v2 = vld [vmem:[#allocation2 + $0x80] sm:$0xff]  ;;  %112 = vst [vmem:[#allocation2] sm:$0xf] %v108_v62  ;;  %114 = vst [vmem:[#allocation2 + $0x50] sm:$0xf] %v110_v63  ;;  %549 = vmatpush1.msra.mxu0 %v480_v1  ;;  %v1037_v62 = vrot.slane %v1024_v43, %v1923_v12  ;;  %v1041_v63 = vrot.slane %v1024_v43, %v1925_v13 }
  0xd3   :  { %115 = vst [vmem:[#allocation2 + $0x18] sm:$0xf] %v111_v0  ;;  %619 = vmatprep.subr.mxu1 %v483_v2  ;;  %v874_v0 = vld [vmem:[#allocation4 + $0x5] ss:$8 sm:$0xf] }
  0xd4   :  { %620 = vmatpush1.msra.mxu1 %v482_v3 }
  0xd5   :  { %v477_v4 = vld [vmem:[#allocation2 + $0x38] sm:$0xff] }
  0xd6   :  { %550 = vmatprep.subr.mxu0 %v477_v4 }
  0xd9   :  { %v476_v7 = vld [vmem:[#allocation2] sm:$0xff]  ;;  %v478_v9 = vld [vmem:[#allocation2 + $0x50] sm:$0xff] }
  0xda   :  { %v479_v8 = vld [vmem:[#allocation2 + $0x18] sm:$0xff]  ;;  %551 = vmatpush1.msra.mxu0 %v476_v7 }
  0xdb   :  { %621 = vmatprep.subr.mxu1 %v479_v8  ;;  %1630 = vmatmul.mubr.msk.f32.vlgmr.msra.gmra.mxu0 %vm503_vm9, %v496_v5  ;;  %v501_v10 = vpop.permute.xlu0 %500  ;;  %v879_v8 = vrot.slane %v874_v0, %v1927_v17 }
  0xdc   :  { %622 = vmatpush1.msra.mxu1 %v478_v9  ;;  %1160 = vmatprep.mubr.f32.mxu0 %v1819_v6  ;;  %v883_v9 = vrot.slane %v874_v0, %v1929_v18 }
  0xdd   :  { %1633 = vmatmul.mubr.msk.f32.vlgmr.msra.gmra.mxu1 %vm503_vm9, %v496_v5 }
  0xde   :  { %1231 = vmatprep.mubr.f32.mxu1 %v1819_v6 }
 0x19b   :  { %v586_v14 = vpop.f32.mrf.mxu0 }
 0x19c   :  { %v587_v15 = vadd.f32 %v586_v14, %v501_v10 }
 0x19d   :  { %v657_v16 = vpop.f32.mrf.mxu1  ;;  %v588_v20 = vpop.f32.mrf.mxu0 }
 0x19e   :  { %v658_v19 = vadd.f32 %v657_v16, %v501_v10  ;;  %v662_v21 = vmax.f32 %v587_v15, 0.0  ;;  %v589_v22 = vadd.f32 %v588_v20, %v501_v10 }
 0x19f   :  { %v659_v23 = vpop.f32.mrf.mxu1 }
 0x1a0   :  { %v664_v24 = vmax.f32 %v658_v19, 0.0  ;;  %v660_v25 = vadd.f32 %v659_v23, %v501_v10  ;;  %858 = vst [vmem:[#allocation3 + $0x88] sm:$0xf] %v662_v21  ;;  %v663_v26 = vmax.f32 %v589_v22, 0.0  ;;  %958 = vrot.lane.b32.xlu1 %v662_v21, %s1811_s26  ;;  %v891_v22 = vrot.slane %v874_v0, %v1925_v13 }
 0x1a1   :  { %v928_v23 = vld [vmem:[#allocation4 + $0x6] ss:$8 sm:$0xf] }
 0x1a2   :  { %860 = vst [vmem:[#allocation3 + $0x40] sm:$0xf] %v664_v24  ;;  %v665_v27 = vmax.f32 %v660_v25, 0.0  ;;  %962 = vrot.lane.b32.xlu0 %v664_v24, %s1811_s26  ;;  %859 = vst [vmem:[#allocation3 + $0x90] sm:$0xf] %v663_v26 }
 0x1a4   :  { %861 = vst [vmem:[#allocation3 + $0x8] sm:$0xf] %v665_v27  ;;  %960 = vrot.lane.b32.xlu1 %v663_v26, %s1811_s26 }
 0x1a6   :  { %1012 = vrot.lane.b32.xlu0 %v662_v21, %s1812_s8 }
 0x1a8   :  { %964 = vrot.lane.b32.xlu1 %v665_v27, %s1811_s26 }
 0x1aa   :  { %1016 = vrot.lane.b32.xlu0 %v664_v24, %s1812_s8 }
 0x1ac   :  { %1014 = vrot.lane.b32.xlu1 %v663_v26, %s1812_s8 }
 0x1ae   :  { %862 = vrot.lane.b32.xlu0 %v662_v21, %s1813_s27 }
 0x1b0   :  { %1018 = vrot.lane.b32.xlu1 %v665_v27, %s1812_s8 }
 0x1b2   :  { %866 = vrot.lane.b32.xlu0 %v664_v24, %s1813_s27 }
 0x1b4   :  { %864 = vrot.lane.b32.xlu1 %v663_v26, %s1813_s27 }
 0x1b6   :  { %916 = vrot.lane.b32.xlu0 %v662_v21, %s1814_s28 }
 0x1b8   :  { %868 = vrot.lane.b32.xlu1 %v665_v27, %s1813_s27 }
 0x1ba   :  { %920 = vrot.lane.b32.xlu0 %v664_v24, %s1814_s28 }
 0x1bc   :  { %918 = vrot.lane.b32.xlu1 %v663_v26, %s1814_s28 }
 0x1be   :  { %804 = vrot.lane.b32.xlu0 %v662_v21, %s1815_s29 }
 0x1c0   :  { %922 = vrot.lane.b32.xlu1 %v665_v27, %s1814_s28 }
 0x1c2   :  { %808 = vrot.lane.b32.xlu0 %v664_v24, %s1815_s29 }
 0x1c4   :  { %806 = vrot.lane.b32.xlu1 %v663_v26, %s1815_s29 }
 0x1c6   :  { %708 = vrot.lane.b32.xlu0 %v662_v21, %s1816_s30 }
 0x1c8   :  { %810 = vrot.lane.b32.xlu1 %v665_v27, %s1815_s29 }
 0x1ca   :  { %712 = vrot.lane.b32.xlu0 %v664_v24, %s1816_s30 }
 0x1cc   :  { %710 = vrot.lane.b32.xlu1 %v663_v26, %s1816_s30 }
 0x1ce   :  { %762 = vrot.lane.b32.xlu0 %v662_v21, %s1817_s10 }
 0x1d0   :  { %714 = vrot.lane.b32.xlu1 %v665_v27, %s1816_s30 }
 0x1d2   :  { %766 = vrot.lane.b32.xlu0 %v664_v24, %s1817_s10 }
 0x1d4   :  { %764 = vrot.lane.b32.xlu1 %v663_v26, %s1817_s10 }
 0x1d6   :  { %666 = vrot.lane.b32.xlu0 %v662_v21, %s1818_s11  ;;  %v887_v21 = vrot.slane %v874_v0, %v1923_v12 }
 0x1d8   :  { %768 = vrot.lane.b32.xlu1 %v665_v27, %s1817_s10 }
 0x1da   :  { %670 = vrot.lane.b32.xlu0 %v664_v24, %s1818_s11 }
 0x1dc   :  { %668 = vrot.lane.b32.xlu1 %v663_v26, %s1818_s11 }
 0x1de   :  { %1078 = vperm.xlu0 %1733, %v1075_v28  }
 0x1e0   :  { %672 = vrot.lane.b32.xlu1 %v665_v27, %s1818_s11 }
 0x1e4   :  { %1242 = vperm.xlu1 %1734, %v1239_v29  }
 0x212   :  { %v959_v31 = vpop.permute.xlu1 %958 }
 0x214   :  { %v963_v32 = vpop.permute.xlu0 %962 }
 0x216   :  { %v961_v35 = vpop.permute.xlu1 %960 }
 0x217   :  { %v967_v36 = vsel %vm384_vm0, %v961_v35, %v963_v32  ;;  %v968_v37 = vsel %vm384_vm0, %v959_v31, %v961_v35  ;;  %v937_v35 = vrot.slane %v928_v23, %v1929_v18 }
 0x218   :  { %v1013_v38 = vpop.permute.xlu0 %1012  ;;  %v992_v39 = vmul.f32 %v975_v33, %v968_v37  ;;  %v993_v40 = vmul.f32 %v979_v34, %v967_v36  ;;  %v933_v34 = vrot.slane %v928_v23, %v1927_v17 }
 0x21a   :  { %v1000_v44 = vrot.slane %v992_v39, 4  ;;  %v1001_v45 = vrot.slane %v993_v40, 4  ;;  %v965_v46 = vpop.permute.xlu1 %964 }
 0x21b   :  { %v966_v47 = vsel %vm384_vm0, %v963_v32, %v965_v46  ;;  %v969_v48 = vsel %vm384_vm0, %v965_v46, %v959_v31  ;;  %v941_v46 = vrot.slane %v928_v23, %v1923_v12 }
 0x21c   :  { %v1017_v49 = vpop.permute.xlu0 %1016  ;;  %1008 = vst [vmem:[#allocation3 + $0x80] sm:$0xf0] %v1000_v44  ;;  %1009 = vst [vmem:[#allocation3 + $0x78] sm:$0xf0] %v1001_v45  ;;  %v994_v50 = vmul.f32 %v983_v41, %v966_v47  ;;  %v995_v51 = vmul.f32 %v987_v42, %v969_v48  ;;  %v945_v47 = vrot.slane %v928_v23, %v1925_v13 }
 0x21d   :  { %v816_v48 = vld [vmem:[#allocation4 + $0x3] ss:$8 sm:$0xf] }
 0x21e   :  { %v1002_v54 = vrot.slane %v994_v50, 4  ;;  %v1003_v55 = vrot.slane %v995_v51, 4  ;;  %v1015_v56 = vpop.permute.xlu1 %1014  ;;  %v833_v0 = vrot.slane %v816_v48, %v1925_v13 }
 0x21f   :  { %v1021_v57 = vsel %vm440_vm1, %v1015_v56, %v1017_v49  ;;  %v1022_v58 = vsel %vm440_vm1, %v1013_v38, %v1015_v56  ;;  %v829_v56 = vrot.slane %v816_v48, %v1923_v12 }
 0x220   :  { %v863_v59 = vpop.permute.xlu0 %862  ;;  %1010 = vst [vmem:[#allocation3 + $0x50] sm:$0xf0] %v1002_v54  ;;  %1011 = vst [vmem:[#allocation3 + $0x10] sm:$0xf0] %v1003_v55  ;;  %v1046_v60 = vmul.f32 %v1029_v52, %v1022_v58  ;;  %v1047_v61 = vmul.f32 %v1033_v53, %v1021_v57  ;;  %v825_v55 = vrot.slane %v816_v48, %v1929_v18 }
 0x222   :  { %1050 = vst [vmem:[#allocation3 + $0x60] sm:$0xf] %v1046_v60  ;;  %1051 = vst [vmem:[#allocation3 + $0x58] sm:$0xf] %v1047_v61  ;;  %v1019_v1 = vpop.permute.xlu1 %1018 }
 0x223   :  { %v1020_v2 = vsel %vm440_vm1, %v1017_v49, %v1019_v1  ;;  %v1023_v3 = vsel %vm440_vm1, %v1019_v1, %v1013_v38 }
 0x224   :  { %v867_v4 = vpop.permute.xlu0 %866  ;;  %v1048_v5 = vmul.f32 %v1037_v62, %v1020_v2  ;;  %v1049_v7 = vmul.f32 %v1041_v63, %v1023_v3  ;;  %v821_v63 = vrot.slane %v816_v48, %v1927_v17  ;;  %v720_v3 = vld [vmem:[#allocation4 + $0x1] ss:$8 sm:$0xf] }
 0x226   :  { %1052 = vst [vmem:[#allocation3 + $0x98] sm:$0xf] %v1048_v5  ;;  %1053 = vst [vmem:[#allocation3 + $0x48] sm:$0xf] %v1049_v7  ;;  %v865_v10 = vpop.permute.xlu1 %864 }
 0x227   :  { %v871_v14 = vsel %vm284_vm2, %v865_v10, %v867_v4  ;;  %v872_v15 = vsel %vm284_vm2, %v863_v59, %v865_v10 }
 0x228   :  { %v917_v16 = vpop.permute.xlu0 %916  ;;  %v896_v19 = vmul.f32 %v879_v8, %v872_v15  ;;  %v897_v20 = vmul.f32 %v883_v9, %v871_v14 }
 0x229   :  { %v1071_v24 = vld [vmem:[#allocation3 + $0x58] sm:$0xf]  ;;  %v1070_v25 = vld [vmem:[#allocation3 + $0x60] sm:$0xf] }
 0x22a   :  { %v904_v26 = vrot.slane %v896_v19, 4  ;;  %v905_v27 = vrot.slane %v897_v20, 4  ;;  %1634 = vmatprep.subr.msk.mxu0 %vm507_vm3, %v1071_v24  ;;  %v869_v28 = vpop.permute.xlu1 %868  ;;  %v729_v20 = vrot.slane %v720_v3, %v1929_v18 }
 0x22b   :  { %v870_v29 = vsel %vm284_vm2, %v867_v4, %v869_v28  ;;  %v873_v30 = vsel %vm284_vm2, %v869_v28, %v863_v59  ;;  %1635 = vmatpush1.msk.msra.mxu0 %vm507_vm3, %v1070_v25 }
 0x22c   :  { %v921_v31 = vpop.permute.xlu0 %920  ;;  %912 = vst [vmem:[#allocation3 + $0x88] sm:$0xf0] %v904_v26  ;;  %913 = vst [vmem:[#allocation3 + $0x90] sm:$0xf0] %v905_v27  ;;  %v898_v32 = vmul.f32 %v887_v21, %v870_v29  ;;  %v899_v33 = vmul.f32 %v891_v22, %v873_v30  ;;  %v733_v21 = vrot.slane %v720_v3, %v1923_v12 }
 0x22d   :  { %v1073_v36 = vld [vmem:[#allocation3 + $0x48] sm:$0xf]  ;;  %v1072_v37 = vld [vmem:[#allocation3 + $0x98] sm:$0xf] }
 0x22e   :  { %v906_v38 = vrot.slane %v898_v32, 4  ;;  %v907_v39 = vrot.slane %v899_v33, 4  ;;  %1637 = vmatprep.subr.msk.mxu1 %vm507_vm3, %v1073_v36  ;;  %v919_v40 = vpop.permute.xlu1 %918  ;;  %v774_v36 = vld [vmem:[#allocation4 + $0x2] ss:$8 sm:$0xf] }
 0x22f   :  { %v925_v41 = vsel %vm340_vm4, %v919_v40, %v921_v31  ;;  %v926_v42 = vsel %vm340_vm4, %v917_v16, %v919_v40  ;;  %1638 = vmatpush1.msk.msra.mxu1 %vm507_vm3, %v1072_v37 }
 0x230   :  { %v805_v43 = vpop.permute.xlu0 %804  ;;  %914 = vst [vmem:[#allocation3 + $0x40] sm:$0xf0] %v906_v38  ;;  %915 = vst [vmem:[#allocation3 + $0x8] sm:$0xf0] %v907_v39  ;;  %v950_v44 = vmul.f32 %v933_v34, %v926_v42  ;;  %v951_v45 = vmul.f32 %v937_v35, %v925_v41  ;;  %v725_v34 = vrot.slane %v720_v3, %v1927_v17 }
 0x231   :  { %v737_v35 = vrot.slane %v720_v3, %v1925_v13 }
 0x232   :  { %954 = vst [vmem:[#allocation3 + $0x80] sm:$0xf] %v950_v44  ;;  %955 = vst [vmem:[#allocation3 + $0x78] sm:$0xf] %v951_v45  ;;  %v923_v49 = vpop.permute.xlu1 %922  ;;  %v783_v45 = vrot.slane %v774_v36, %v1929_v18 }
 0x233   :  { %v924_v50 = vsel %vm340_vm4, %v921_v31, %v923_v49  ;;  %v927_v51 = vsel %vm340_vm4, %v923_v49, %v917_v16  ;;  %v1063_v14 = vld [vmem:[#allocation3 + $0x90] sm:$0xff]  ;;  %v1062_v19 = vld [vmem:[#allocation3 + $0x88] sm:$0xff] }
 0x234   :  { %v809_v52 = vpop.permute.xlu0 %808  ;;  %v952_v53 = vmul.f32 %v941_v46, %v924_v50  ;;  %v953_v54 = vmul.f32 %v945_v47, %v927_v51  ;;  %v787_v46 = vrot.slane %v774_v36, %v1923_v12 }
 0x236   :  { %956 = vst [vmem:[#allocation3 + $0x50] sm:$0xf] %v952_v53  ;;  %957 = vst [vmem:[#allocation3 + $0x10] sm:$0xf] %v953_v54  ;;  %v807_v57 = vpop.permute.xlu1 %806 }
 0x237   :  { %v813_v58 = vsel %vm224_vm5, %v807_v57, %v809_v52  ;;  %v814_v59 = vsel %vm224_vm5, %v805_v43, %v807_v57  ;;  %v1065_v30 = vld [vmem:[#allocation3 + $0x8] sm:$0xff]  ;;  %v1064_v33 = vld [vmem:[#allocation3 + $0x40] sm:$0xff] }
 0x238   :  { %v709_v60 = vpop.permute.xlu0 %708  ;;  %v839_v61 = vmul.f32 %v825_v55, %v814_v59  ;;  %v840_v62 = vmul.f32 %v829_v56, %v813_v58  ;;  %v779_v55 = vrot.slane %v774_v36, %v1927_v17  ;;  %v791_v56 = vrot.slane %v774_v36, %v1925_v13  ;;  %v678_v57 = vld [vmem:[#allocation4] ss:$8 sm:$0xf] }
 0x239   :  { %v1067_v1 = vld [vmem:[#allocation3 + $0x78] sm:$0xff]  ;;  %v1066_v2 = vld [vmem:[#allocation3 + $0x80] sm:$0xff]  ;;  %v1436_v36 = vld [vmem:[#allocation7 + $0xe8] sm:$0xff] }
 0x23a   :  { %v847_v4 = vrot.slane %v839_v61, 4  ;;  %v848_v5 = vrot.slane %v840_v62, 4  ;;  %1120 = vmatprep.subr.mxu0 %v1067_v1  ;;  %v811_v7 = vpop.permute.xlu1 %810 }
 0x23b   :  { %v812_v8 = vsel %vm224_vm5, %v809_v52, %v811_v7  ;;  %v815_v9 = vsel %vm224_vm5, %v811_v7, %v805_v43  ;;  %1121 = vmatpush1.msra.mxu0 %v1066_v2 }
 0x23c   :  { %v713_v10 = vpop.permute.xlu0 %712  ;;  %855 = vst [vmem:[#allocation3 + $0x30] sm:$0xf0] %v847_v4  ;;  %856 = vst [vmem:[#allocation3] sm:$0xf0] %v848_v5  ;;  %v838_v15 = vmul.f32 %v821_v63, %v815_v9  ;;  %v841_v16 = vmul.f32 %v833_v0, %v812_v8  ;;  %1122 = vmatprep.subr.mxu0 %v1063_v14  ;;  %v687_v63 = vrot.slane %v678_v57, %v1929_v18 }
 0x23d   :  { %1123 = vmatpush1.msra.mxu0 %v1062_v19  ;;  %v1069_v22 = vld [vmem:[#allocation3 + $0x10] sm:$0xff]  ;;  %v691_v0 = vrot.slane %v678_v57, %v1923_v12  ;;  %v683_v8 = vrot.slane %v678_v57, %v1927_v17  ;;  %v695_v9 = vrot.slane %v678_v57, %v1925_v13  ;;  %v1415_v57 = vld [vmem:[#allocation7 + $0x40] sm:$0xff] }
 0x23e   :  { %v1068_v23 = vld [vmem:[#allocation3 + $0x50] sm:$0xff]  ;;  %v846_v24 = vrot.slane %v838_v15, 4  ;;  %v849_v25 = vrot.slane %v841_v16, 4  ;;  %1191 = vmatprep.subr.mxu1 %v1069_v22  ;;  %v711_v26 = vpop.permute.xlu1 %710  ;;  %v1247_v22 = vcombine.high %v1737_v11, %v1737_v11 }
 0x23f   :  { %v717_v27 = vsel %vm124_vm6, %v711_v26, %v713_v10  ;;  %v718_v28 = vsel %vm124_vm6, %v709_v60, %v711_v26  ;;  %1192 = vmatpush1.msra.mxu1 %v1068_v23 }
 0x240   :  { %v763_v29 = vpop.permute.xlu0 %762  ;;  %854 = vst [vmem:[#allocation3 + $0x70] sm:$0xf0] %v846_v24  ;;  %857 = vst [vmem:[#allocation3 + $0x20] sm:$0xf0] %v849_v25  ;;  %v743_v31 = vmul.f32 %v729_v20, %v718_v28  ;;  %v744_v32 = vmul.f32 %v733_v21, %v717_v27  ;;  %1193 = vmatprep.subr.mxu1 %v1065_v30  ;;  %v1074_v21 = vld [vmem:[%s2211_s4] sm:$0xff]  ;;  %v1738_v25 = vld [vmem:[%s2207_s0 + $0x8] sm:$0xff] }
 0x241   :  { %1194 = vmatpush1.msra.mxu1 %v1064_v33  ;;  %v1248_v26 = vcombine.high %v1738_v25, %v1738_v25  ;;  %v1238_v28 = vld [vmem:[%s2213_s6] sm:$0xff]  ;;  %v1422_v30 = vld [vmem:[#allocation7 + $0x78] sm:$0xff]  ;;  %s1821_s0 = smov [#allocation9]  }
 0x242   :  { %v751_v37 = vrot.slane %v743_v31, 4  ;;  %v752_v38 = vrot.slane %v744_v32, 4  ;;  %v715_v39 = vpop.permute.xlu1 %714  ;;  %v1470_v31 = vld [vmem:[#allocation7 + $0x1f8] sm:$0xff]  ;;  %v1437_v32 = vld [vmem:[#allocation7 + $0xf0] sm:$0xff]  ;;  %s1618_s6 = sshll.u32 %s1821_s0, 4  ;;  %s1619_s6 = int_to_ptr.vmem [resolvable:$true] %s1618_s6 }
 0x243   :  { %v716_v40 = vsel %vm124_vm6, %v713_v10, %v715_v39  ;;  %v719_v41 = vsel %vm124_vm6, %v715_v39, %v709_v60  ;;  %v1454_v33 = vld [vmem:[#allocation7 + $0x178] sm:$0xff]  ;;  %v1468_v39 = vld [vmem:[#allocation7 + $0x1e8] sm:$0xff]  ;;  %s1779_s1 = scalar_lea.vmem %s1619_s6, 128  ;;  %p1784_p11 = scmp.lt.s32.totalorder %s1619_s6, %s1619_s6 }
 0x244   :  { %v767_v42 = vpop.permute.xlu0 %766  ;;  %759 = vst [vmem:[#allocation3 + $0x38] sm:$0xf0] %v751_v37  ;;  %760 = vst [vmem:[#allocation3 + $0x68] sm:$0xf0] %v752_v38  ;;  %v742_v43 = vmul.f32 %v725_v34, %v719_v41  ;;  %v745_v44 = vmul.f32 %v737_v35, %v716_v40  ;;  %v1421_v34 = vld [vmem:[#allocation7 + $0x70] sm:$0xff]  ;;  %v1420_v38 = vld [vmem:[#allocation7 + $0x68] sm:$0xff]  ;;  %p1780_p10 = scmp.ne.s32.totalorder %s1619_s6, %s1779_s1  ;;  %p1785_p12 = scmp.lt.s32.totalorder %s1779_s1, %s1779_s1 }
 0x245   :  { %v1469_v35 = vld [vmem:[#allocation7 + $0x1f0] sm:$0xff]  ;;  %v1435_v40 = vld [vmem:[#allocation7 + $0xe0] sm:$0xff]  ;;  %v1452_v41 = vld [vmem:[#allocation7 + $0x168] sm:$0xff] }
 0x246   :  { %v750_v47 = vrot.slane %v742_v43, 4  ;;  %v753_v48 = vrot.slane %v745_v44, 4  ;;  %v765_v49 = vpop.permute.xlu1 %764  ;;  %v1453_v37 = vld [vmem:[#allocation7 + $0x170] sm:$0xff]  ;;  %v1434_v43 = vld [vmem:[#allocation7 + $0xd8] sm:$0xff]  ;;  %v1451_v44 = vld [vmem:[#allocation7 + $0x160] sm:$0xff]  ;;  %p1786_p13 = por %p1785_p12, %p1784_p11 }
 0x247   :  { %v771_v50 = vsel %vm180_vm7, %v765_v49, %v767_v42  ;;  %v772_v51 = vsel %vm180_vm7, %v763_v29, %v765_v49  ;;  %v1417_v49 = vld [vmem:[#allocation7 + $0x50] sm:$0xff] }
 0x248   :  { %758 = vst [vmem:[#allocation3 + $0x28] sm:$0xf0] %v750_v47  ;;  %761 = vst [vmem:[#allocation3 + $0x18] sm:$0xf0] %v753_v48  ;;  %v797_v52 = vmul.f32 %v783_v45, %v772_v51  ;;  %v798_v53 = vmul.f32 %v787_v46, %v771_v50  ;;  %v667_v54 = vpop.permute.xlu0 %666  ;;  %v1418_v45 = vld [vmem:[#allocation7 + $0x58] sm:$0xff]  ;;  %v1433_v47 = vld [vmem:[#allocation7 + $0xd0] sm:$0xff]  ;;  %p1787_p0 = pnand %p1786_p13, %p1780_p10 }
 0x249   :  { %v1466_v46 = vld [vmem:[#allocation7 + $0x1d8] sm:$0xff]  ;;  %v1465_v50 = vld [vmem:[#allocation7 + $0x1d0] sm:$0xff]  ;;  %v1432_v51 = vld [vmem:[#allocation7 + $0xc8] sm:$0xff] }
 0x24a   :  { %801 = vst [vmem:[#allocation3 + $0x30] sm:$0xf] %v797_v52  ;;  %802 = vst [vmem:[#allocation3] sm:$0xf] %v798_v53  ;;  %v769_v58 = vpop.permute.xlu1 %768  ;;  %v1450_v48 = vld [vmem:[#allocation7 + $0x158] sm:$0xff]  ;;  %v1449_v52 = vld [vmem:[#allocation7 + $0x150] sm:$0xff] }
 0x24b   :  { %v770_v59 = vsel %vm180_vm7, %v767_v42, %v769_v58  ;;  %v773_v60 = vsel %vm180_vm7, %v769_v58, %v763_v29  ;;  %v1438_v29 = vld [vmem:[#allocation7 + $0xf8] sm:$0xff]  ;;  %v1467_v42 = vld [vmem:[#allocation7 + $0x1e0] sm:$0xff]  ;;  %v1416_v53 = vld [vmem:[#allocation7 + $0x48] sm:$0xff] }
 0x24c   :  { %v796_v61 = vmul.f32 %v779_v55, %v773_v60  ;;  %v799_v62 = vmul.f32 %v791_v56, %v770_v59  ;;  %v671_v1 = vpop.permute.xlu0 %670  ;;  %v1431_v55 = vld [vmem:[#allocation7 + $0xc0] sm:$0xff]  ;;  %v1448_v56 = vld [vmem:[#allocation7 + $0x148] sm:$0xff]  ;;  %v1430_v59 = vld [vmem:[#allocation7 + $0xb8] sm:$0xff] }
 0x24d   :  { %v1463_v58 = vld [vmem:[#allocation7 + $0x1c0] sm:$0xff] }
 0x24e   :  { %800 = vst [vmem:[#allocation3 + $0x70] sm:$0xf] %v796_v61  ;;  %803 = vst [vmem:[#allocation3 + $0x20] sm:$0xf] %v799_v62  ;;  %v669_v2 = vpop.permute.xlu1 %668  ;;  %v1447_v60 = vld [vmem:[#allocation7 + $0x140] sm:$0xff]  ;;  %v1414_v61 = vld [vmem:[#allocation7 + $0x38] sm:$0xff] }
 0x24f   :  { %v675_v3 = vsel %vm81_vm8, %v669_v2, %v671_v1  ;;  %v676_v4 = vsel %vm81_vm8, %v667_v54, %v669_v2  ;;  %v1462_v62 = vld [vmem:[#allocation7 + $0x1b8] sm:$0xff]  ;;  %v1461_v2 = vld [vmem:[#allocation7 + $0x1b0] sm:$0xff] }
 0x250   :  { %v701_v5 = vmul.f32 %v687_v63, %v676_v4  ;;  %v702_v7 = vmul.f32 %v691_v0, %v675_v3  ;;  %v1429_v63 = vld [vmem:[#allocation7 + $0xb0] sm:$0xff]  ;;  %v1446_v0 = vld [vmem:[#allocation7 + $0x138] sm:$0xff]  ;;  %v1428_v3 = vld [vmem:[#allocation7 + $0xa8] sm:$0xff] }
 0x251   :  { %v1059_v10 = vld [vmem:[#allocation3 + $0x30] sm:$0xff]  ;;  %v1060_v13 = vld [vmem:[#allocation3] sm:$0xff] }
 0x252   :  { %705 = vst [vmem:[#allocation3 + $0x38] sm:$0xf] %v701_v5  ;;  %706 = vst [vmem:[#allocation3 + $0x68] sm:$0xf] %v702_v7  ;;  %v673_v12 = vpop.permute.xlu1 %672  ;;  %1124 = vmatprep.subr.mxu0 %v1059_v10  ;;  %v1445_v4 = vld [vmem:[#allocation7 + $0x130] sm:$0xff]  ;;  %v1412_v5 = vld [vmem:[#allocation7 + $0x28] sm:$0xff] }
 0x253   :  { %v674_v18 = vsel %vm81_vm8, %v671_v1, %v673_v12  ;;  %v677_v14 = vsel %vm81_vm8, %v673_v12, %v667_v54  ;;  %v1464_v54 = vld [vmem:[#allocation7 + $0x1c8] sm:$0xff]  ;;  %v1413_v1 = vld [vmem:[#allocation7 + $0x30] sm:$0xff]  ;;  %v1411_v10 = vld [vmem:[#allocation7 + $0x20] sm:$0xff] }
 0x254   :  { %v700_v15 = vmul.f32 %v683_v8, %v677_v14  ;;  %v703_v16 = vmul.f32 %v695_v9, %v674_v18  ;;  %v1460_v7 = vld [vmem:[#allocation7 + $0x1a8] sm:$0xff]  ;;  %v1427_v8 = vld [vmem:[#allocation7 + $0xa0] sm:$0xff]  ;;  %v1426_v14 = vld [vmem:[#allocation7 + $0x98] sm:$0xff] }
 0x255   :  { %v1058_v19 = vld [vmem:[#allocation3 + $0x70] sm:$0xff]  ;;  %v1061_v20 = vld [vmem:[#allocation3 + $0x20] sm:$0xff]  ;;  %v1444_v9 = vld [vmem:[#allocation7 + $0x128] sm:$0xff] }
 0x256   :  { %704 = vst [vmem:[#allocation3 + $0x28] sm:$0xf] %v700_v15  ;;  %707 = vst [vmem:[#allocation3 + $0x18] sm:$0xf] %v703_v16  ;;  %1125 = vmatpush1.msra.mxu0 %v1058_v19  ;;  %1195 = vmatprep.subr.mxu1 %v1061_v20  ;;  %v1459_v12 = vld [vmem:[#allocation7 + $0x1a0] sm:$0xff]  ;;  %v1410_v15 = vld [vmem:[#allocation7 + $0x18] sm:$0xff] }
 0x257   :  { %1196 = vmatpush1.msra.mxu1 %v1060_v13  ;;  %v1443_v18 = vld [vmem:[#allocation7 + $0x120] sm:$0xff]  ;;  %v1458_v16 = vld [vmem:[#allocation7 + $0x198] sm:$0xff]  ;;  %v1425_v19 = vld [vmem:[#allocation7 + $0x90] sm:$0xff] }
 0x258   :  { %v1442_v20 = vld [vmem:[#allocation7 + $0x118] sm:$0xff]  ;;  %v1409_v13 = vld [vmem:[#allocation7 + $0x10] sm:$0xff] }
 0x259   :  { %v1055_v17 = vld [vmem:[#allocation3 + $0x38] sm:$0xff]  ;;  %v1056_v27 = vld [vmem:[#allocation3 + $0x68] sm:$0xff] }
 0x25a   :  { %1126 = vmatprep.subr.mxu0 %v1055_v17  ;;  %v1457_v17 = vld [vmem:[#allocation7 + $0x190] sm:$0xff] }
 0x25d   :  { %v1054_v23 = vld [vmem:[#allocation3 + $0x28] sm:$0xff]  ;;  %v1057_v24 = vld [vmem:[#allocation3 + $0x18] sm:$0xff] }
 0x25e   :  { %1127 = vmatpush1.msra.mxu0 %v1054_v23  ;;  %1197 = vmatprep.subr.mxu1 %v1057_v24  ;;  %v1456_v23 = vld [vmem:[#allocation7 + $0x188] sm:$0xff]  ;;  %v1423_v24 = vld [vmem:[#allocation7 + $0x80] sm:$0xff] }
 0x25f   :  { %1636 = vmatmul.mubr.msk.f32.vlgmr.msra.gmra.mxu0 %vm503_vm9, %v1074_v21  ;;  %1198 = vmatpush1.msra.mxu1 %v1056_v27  ;;  %v1455_v27 = vld [vmem:[#allocation7 + $0x180] sm:$0xff] }
 0x260   :  { %1639 = vmatmul.mubr.msk.f32.vlgmr.msra.gmra.mxu1 %vm503_vm9, %v1074_v21  ;;  %1640 = vmatprep.subr.msk.mxu0 %vm507_vm3, %v1247_v22  ;;  %v1424_v21 = vld [vmem:[#allocation7 + $0x88] sm:$0xff] }
 0x261   :  { %1643 = vmatprep.subr.msk.mxu1 %vm507_vm3, %v1248_v26  ;;  %1641 = vmatpush1.msk.msra.mxu0 %vm507_vm3, %v1737_v11  ;;  %v1441_v11 = vld [vmem:[#allocation7 + $0x110] sm:$0xff]  ;;  %v1408_v22 = vld [vmem:[#allocation7 + $0x8] sm:$0xff]  ;;  %v1407_v26 = vld [vmem:[#allocation7] sm:$0xff] }
 0x262   :  { %1644 = vmatpush1.msk.msra.mxu1 %vm507_vm3, %v1738_v25  ;;  %1325 = vmatprep.mubr.f32.mxu0 %v1819_v6  ;;  %v1440_v25 = vld [vmem:[#allocation7 + $0x108] sm:$0xff] }
 0x263   :  { %1642 = vmatmul.mubr.msk.f32.vlgmr.msra.gmra.mxu0 %vm1249_vm10, %v1238_v28  ;;  %1396 = vmatprep.mubr.f32.mxu1 %v1819_v6  ;;  %v1419_v6 = vld [vmem:[#allocation7 + $0x60] sm:$0xff] }
 0x264   :  { %1645 = vmatmul.mubr.msk.f32.vlgmr.msra.gmra.mxu1 %vm1249_vm10, %v1238_v28  ;;  %1646 = vmatprep.subr.mxu0 %v1438_v29  ;;  %v1439_v28 = vld [vmem:[#allocation7 + $0x100] sm:$0xff] }
 0x265   :  { %1647 = vmatpush3.msra.mxu0 %v1422_v30  ;;  %1681 = vmatprep.subr.mxu1 %v1470_v31 }
 0x266   :  { %1648 = vmatprep.subr.mxu0 %v1437_v32  ;;  %1682 = vmatpush3.msra.mxu1 %v1454_v33  ;;  %v1243_v33 = vpop.permute.xlu1 %1242 }
 0x267   :  { %1649 = vmatpush3.msra.mxu0 %v1421_v34  ;;  %1683 = vmatprep.subr.mxu1 %v1469_v35 }
 0x268   :  { %1650 = vmatprep.subr.mxu0 %v1436_v36  ;;  %1684 = vmatpush3.msra.mxu1 %v1453_v37  ;;  %v1079_v36 = vpop.permute.xlu0 %1078 }
 0x269   :  { %1651 = vmatpush3.msra.mxu0 %v1420_v38  ;;  %1685 = vmatprep.subr.mxu1 %v1468_v39 }
 0x26a   :  { %1652 = vmatprep.subr.mxu0 %v1435_v40  ;;  %1686 = vmatpush3.msra.mxu1 %v1452_v41 }
 0x26b   :  { %1653 = vmatpush3.msra.mxu0 %v1419_v6  ;;  %1687 = vmatprep.subr.mxu1 %v1467_v42 }
 0x26c   :  { %1654 = vmatprep.subr.mxu0 %v1434_v43  ;;  %1688 = vmatpush3.msra.mxu1 %v1451_v44 }
 0x26d   :  { %1655 = vmatpush3.msra.mxu0 %v1418_v45  ;;  %1689 = vmatprep.subr.mxu1 %v1466_v46 }
 0x26e   :  { %1656 = vmatprep.subr.mxu0 %v1433_v47  ;;  %1690 = vmatpush3.msra.mxu1 %v1450_v48 }
 0x26f   :  { %1657 = vmatpush3.msra.mxu0 %v1417_v49  ;;  %1691 = vmatprep.subr.mxu1 %v1465_v50 }
 0x270   :  { %1658 = vmatprep.subr.mxu0 %v1432_v51  ;;  %1692 = vmatpush3.msra.mxu1 %v1449_v52 }
 0x271   :  { %1659 = vmatpush3.msra.mxu0 %v1416_v53  ;;  %1693 = vmatprep.subr.mxu1 %v1464_v54 }
 0x272   :  { %1660 = vmatprep.subr.mxu0 %v1431_v55  ;;  %1694 = vmatpush3.msra.mxu1 %v1448_v56 }
 0x273   :  { %1661 = vmatpush3.msra.mxu0 %v1415_v57  ;;  %1695 = vmatprep.subr.mxu1 %v1463_v58 }
 0x274   :  { %1662 = vmatprep.subr.mxu0 %v1430_v59  ;;  %1696 = vmatpush3.msra.mxu1 %v1447_v60 }
 0x275   :  { %1663 = vmatpush3.msra.mxu0 %v1414_v61  ;;  %1697 = vmatprep.subr.mxu1 %v1462_v62 }
 0x276   :  { %1664 = vmatprep.subr.mxu0 %v1429_v63  ;;  %1698 = vmatpush3.msra.mxu1 %v1446_v0 }
 0x277   :  { %1665 = vmatpush3.msra.mxu0 %v1413_v1  ;;  %1699 = vmatprep.subr.mxu1 %v1461_v2 }
 0x278   :  { %1666 = vmatprep.subr.mxu0 %v1428_v3  ;;  %1700 = vmatpush3.msra.mxu1 %v1445_v4 }
 0x279   :  { %1667 = vmatpush3.msra.mxu0 %v1412_v5  ;;  %1701 = vmatprep.subr.mxu1 %v1460_v7 }
 0x27a   :  { %1668 = vmatprep.subr.mxu0 %v1427_v8  ;;  %1702 = vmatpush3.msra.mxu1 %v1444_v9 }
 0x27b   :  { %1669 = vmatpush3.msra.mxu0 %v1411_v10  ;;  %1703 = vmatprep.subr.mxu1 %v1459_v12 }
 0x27c   :  { %1704 = vmatpush3.msra.mxu1 %v1443_v18  ;;  %1670 = vmatprep.subr.mxu0 %v1426_v14 }
 0x27d   :  { %1671 = vmatpush3.msra.mxu0 %v1410_v15  ;;  %1705 = vmatprep.subr.mxu1 %v1458_v16 }
 0x27e   :  { %1672 = vmatprep.subr.mxu0 %v1425_v19  ;;  %1706 = vmatpush3.msra.mxu1 %v1442_v20 }
 0x27f   :  { %1673 = vmatpush3.msra.mxu0 %v1409_v13  ;;  %1707 = vmatprep.subr.mxu1 %v1457_v17 }
 0x280   :  { %1674 = vmatprep.subr.mxu0 %v1424_v21  ;;  %1708 = vmatpush3.msra.mxu1 %v1441_v11 }
 0x281   :  { %1675 = vmatpush3.msra.mxu0 %v1408_v22  ;;  %1709 = vmatprep.subr.mxu1 %v1456_v23 }
 0x282   :  { %1676 = vmatprep.subr.mxu0 %v1423_v24  ;;  %1710 = vmatpush3.msra.mxu1 %v1440_v25 }
 0x283   :  { %1677 = vmatpush3.msra.mxu0 %v1407_v26  ;;  %1711 = vmatprep.subr.mxu1 %v1455_v27 }
 0x284   :  { %1712 = vmatpush3.msra.mxu1 %v1439_v28 }
 0x31f   :  { %v1162_v29 = vpop.f32.mrf.mxu0 }
 0x320   :  { %v1233_v30 = vpop.f32.mrf.mxu1  ;;  %v1163_v42 = vadd.f32 %v1162_v29, %v1079_v36 }
 0x321   :  { %v1164_v31 = vpop.f32.mrf.mxu0  ;;  %v1234_v45 = vadd.f32 %v1233_v30, %v1079_v36 }
 0x322   :  { %v1235_v32 = vpop.f32.mrf.mxu1  ;;  %v1165_v39 = vadd.f32 %v1164_v31, %v1079_v36 }
 0x323   :  { %v1327_v34 = vpop.f32.mrf.mxu0  ;;  %v1236_v43 = vadd.f32 %v1235_v32, %v1079_v36 }
 0x324   :  { %v1398_v35 = vpop.f32.mrf.mxu1  ;;  %v1328_v37 = vadd.f32 %v1327_v34, %v1243_v33 }
 0x325   :  { %v1329_v38 = vpop.f32.mrf.mxu0  ;;  %v1399_v40 = vadd.f32 %v1398_v35, %v1243_v33 }
 0x326   :  { %v1330_v41 = vadd.f32 %v1329_v38, %v1243_v33  ;;  %v1400_v6 = vpop.f32.mrf.mxu1  ;;  %v1403_v47 = vadd.f32 %v1328_v37, %v1163_v42 }
 0x327   :  { %v1401_v44 = vadd.f32 %v1400_v6, %v1243_v33  ;;  %v1405_v49 = vadd.f32 %v1399_v40, %v1234_v45 }
 0x328   :  { %v1404_v46 = vadd.f32 %v1330_v41, %v1165_v39 }
 0x329   :  { %v1406_v48 = vadd.f32 %v1401_v44, %v1236_v43 }
 0x32a   :  { %1535 = vmatprep.mubr.f32.mxu0 %v1404_v46 }
 0x32b   :  { %1536 = vmatmul.mubr.f32.vlgmr.msra.gmra.mxu0 %v1403_v47  ;;  %1605 = vmatprep.mubr.f32.mxu1 %v1406_v48 }
 0x32c   :  { %1606 = vmatmul.mubr.f32.vlgmr.msra.gmra.mxu1 %v1405_v49 }
 0x3eb   :  { %v1678_v50 = vpop.f32.mrf.mxu0 }
 0x3ec   :  { %v1713_v51 = vpop.f32.mrf.mxu1 }
 0x3ed   :  { %v1679_v52 = vpop.f32.mrf.mxu0 }
 0x3ee   :  { %v1680_v53 = vadd.f32 %v1679_v52, %v1678_v50  ;;  %v1714_v54 = vpop.f32.mrf.mxu1 }
 0x3ef   :  { %v1715_v55 = vadd.f32 %v1714_v54, %v1713_v51 }
 0x3f1   :  { %v1608_v56 = vadd.f32 %v1715_v55, %v1680_v53 }
 0x3f3   :  { %1611 = vst [vmem:[#allocation9] sm:$0xff] %v1608_v56 }
 0x3f4   :  { %1790 = shalt.err (!%p1787_p0)
}
 0x3f5   :  { %1621 = dma.vmem_to_hbm [thread:$0]  %s1619_s6, 128, %s2216_s9, [#allocation6]  }
 0x3f6   :  { %1803 = dma.done.wait [#allocation6], 128  }
 0x3f7   :  { %1804 = vsyncadd [#allocation6], 4294967168 }
 0x3f8   :  { %1625 = vsyncpa [#allocation5], 1 }
 0x3f9   :  { %1626 = vsyncpa [#allocation8], 1 }
 0x3fa   :  { %1627 = vsyncpa [#allocation6], 1 }

</bundles_post_ra>
